<compile_context>
chip_gen: v7x
topology: tpu7x:2x2x1
jax: 0.10.0
libtpu: 0.0.40
codegen_flags: <defaults>
</compile_context>

<pallas_src>
import jax
import jax.numpy as jnp
import numpy as np
from jax.experimental import pallas as pl
from jax.experimental.pallas import tpu as pltpu

# ---- hyperparams of the synthetic CLIP vision tower (small shapes) ----------
BATCH = 2
IN_CH = 3
IMG = 16
PATCH = 8
GRID = IMG // PATCH                 # 2
N_PATCH = GRID * GRID               # 4 patches per image
SEQ = N_PATCH + 1                   # 5 real tokens (class + patches)
SEQ_P = 8                           # padded tokens per image (full sublane tile)
WIDTH = 32
LAYERS = 2
HEADS = 4
HEAD_DIM = WIDTH // HEADS           # 8
MLP_DIM = 4 * WIDTH                 # 128
OUT_DIM = 16
LN_EPS = 1e-5
ATTN_SCALE = 1.0 / float(np.sqrt(HEAD_DIM))
NEG_INF = -1e30

BS_P = BATCH * SEQ_P                # 16 resident activation rows
HBS = HEADS * BS_P                  # 64 head-stacked rows
PATCH_DIM = IN_CH * PATCH * PATCH   # 192


# ---------------- structural constants (parameter independent, built once) ----
def _structural_constants():
    scat = np.zeros((BS_P, BATCH * N_PATCH), np.float32)   # place patch embeds
    rep = np.zeros((HBS, BS_P), np.float32)                # head replication
    hmask = np.zeros((HBS, WIDTH), np.float32)             # per-head column mask
    bias = np.full((HBS, HBS), NEG_INF, np.float32)        # (head,batch,pad) mask
    sel = np.zeros((BATCH, BS_P), np.float32)              # cls-token selector
    for b in range(BATCH):
        sel[b, b * SEQ_P] = 1.0
        for t in range(1, SEQ):
            scat[b * SEQ_P + t, b * N_PATCH + (t - 1)] = 1.0
    for h in range(HEADS):
        hmask[h * BS_P:(h + 1) * BS_P, h * HEAD_DIM:(h + 1) * HEAD_DIM] = 1.0
        for r in range(BS_P):
            rep[h * BS_P + r, r] = 1.0
        for b in range(BATCH):
            base = h * BS_P + b * SEQ_P
            # queries: all (incl. pad rows, discarded later); keys: real tokens only
            bias[base:base + SEQ_P, base:base + SEQ] = 0.0
    col = np.ascontiguousarray(rep.T)
    return tuple(jnp.asarray(a) for a in (scat, rep, col, hmask, bias, sel))


SCATTER, REP, COL, HMASK, ATTN_BIAS, SEL = _structural_constants()


# ------------------------------ in-kernel helpers -----------------------------
def _ln(x, g, b):
    mu = jnp.mean(x, axis=-1, keepdims=True)
    var = jnp.mean(jnp.square(x - mu), axis=-1, keepdims=True)
    return (x - mu) * jax.lax.rsqrt(var + LN_EPS) * g + b


# ------------------------------ fused forward kernel --------------------------
def _clip_fwd_kernel(
        # constant inputs (same block every grid step)
        patches_ref, convw_ref, scatter_ref, seed_ref, lnpg_ref, lnpb_ref,
        rep_ref, col_ref, hmask_ref, abias_ref, sel_ref,
        lnqg_ref, lnqb_ref, proj_ref,
        # per-layer weights (layer-indexed BlockSpecs)
        ln1g_ref, ln1b_ref, wq_ref, bq_ref, wk_ref, bk_ref, wv_ref, bv_ref,
        outw_ref, outb_ref, ln2g_ref, ln2b_ref, f1w_ref, f1b_ref, f2w_ref, f2b_ref,
        # output
        emb_ref,
        # scratch: VMEM-resident activation, persists across grid (layer) steps
        x_ref):
    layer = pl.program_id(0)
    f32 = jnp.float32

    # ---- layer 0: conv1 patch-embed matmul + cls/pos seeding + ln_pre ----
    @pl.when(layer == 0)
    def _():
        pe = jnp.dot(patches_ref[...], convw_ref[...],
                     preferred_element_type=f32)                     # [B*GG, W]
        x0 = jnp.dot(scatter_ref[...], pe,
                     preferred_element_type=f32) + seed_ref[...]     # [BS_P, W]
        x_ref[...] = _ln(x0, lnpg_ref[...], lnpb_ref[...])

    x = x_ref[...]                                                   # [BS_P, W]
    rep = rep_ref[...]                                               # [HBS, BS_P]
    hm = hmask_ref[...]                                              # [HBS, W]

    # ---------------- multi-head self-attention (head-batched) ----------------
    h = _ln(x, ln1g_ref[0], ln1b_ref[0])
    h_rep = jnp.dot(rep, h, preferred_element_type=f32)              # [HBS, W]
    # 1/sqrt(head_dim) is baked into wq/bq host-side.
    q = (jnp.dot(h_rep, wq_ref[0], preferred_element_type=f32) + bq_ref[0]) * hm
    k = jnp.dot(h_rep, wk_ref[0], preferred_element_type=f32) + bk_ref[0]
    v = (jnp.dot(h_rep, wv_ref[0], preferred_element_type=f32) + bv_ref[0]) * hm
    # one score matmul for all heads; masking q per head makes the diagonal
    # (same-head) blocks equal the per-head dot products.
    s = jax.lax.dot_general(q, k, (((1,), (1,)), ((), ())),
                            preferred_element_type=f32)              # [HBS, HBS]
    s = s + abias_ref[...]                                           # head/batch/pad mask
    s = s - jnp.max(s, axis=-1, keepdims=True)
    p = jnp.exp(s)
    p = p * pl.reciprocal(jnp.sum(p, axis=-1, keepdims=True), approx=True)
    o = jnp.dot(p, v, preferred_element_type=f32)                    # [HBS, W]
    attn = jnp.dot(col_ref[...], o, preferred_element_type=f32)      # [BS_P, W] (concat heads)
    x = x + jnp.dot(attn, outw_ref[0], preferred_element_type=f32) + outb_ref[0]

    # ---------------- MLP branch (QuickGELU) ----------------
    h = _ln(x, ln2g_ref[0], ln2b_ref[0])
    h = jnp.dot(h, f1w_ref[0], preferred_element_type=f32) + f1b_ref[0]
    h = h * jax.nn.sigmoid(1.702 * h)                                # QuickGELU (CLIP)
    x = x + jnp.dot(h, f2w_ref[0], preferred_element_type=f32) + f2b_ref[0]

    x_ref[...] = x

    # ---- last layer: ln_post(cls) @ proj, written to the single output ----
    @pl.when(layer == LAYERS - 1)
    def _():
        cls = jnp.dot(sel_ref[...], x, preferred_element_type=f32)   # [B, W]
        cls = _ln(cls, lnqg_ref[...], lnqb_ref[...])
        emb_ref[...] = jnp.dot(cls, proj_ref[...], preferred_element_type=f32)


# ------------------------------ kernel wrapper --------------------------------
def _const_spec(shape):
    return pl.BlockSpec(shape, lambda l: (0, 0))


def _layer_spec(rows, cols):
    return pl.BlockSpec((1, rows, cols), lambda l: (l, 0, 0))


_LAYER_ORDER = ["ln1_g", "ln1_b", "wq", "bq", "wk", "bk", "wv", "bv",
                "out_w", "out_b", "ln2_g", "ln2_b",
                "fc1_w", "fc1_b", "fc2_w", "fc2_b"]


def clip_forward_fused(patches, conv_w, seed_add, ln_pre_g, ln_pre_b,
                       ln_post_g, ln_post_b, proj, layer_w):
    const_inputs = [patches, conv_w, SCATTER, seed_add,
                    ln_pre_g.reshape(1, WIDTH), ln_pre_b.reshape(1, WIDTH),
                    REP, COL, HMASK, ATTN_BIAS, SEL,
                    ln_post_g.reshape(1, WIDTH), ln_post_b.reshape(1, WIDTH), proj]
    layer_inputs = [layer_w[name] for name in _LAYER_ORDER]

    in_specs = ([_const_spec(a.shape) for a in const_inputs] +
                [_layer_spec(a.shape[1], a.shape[2]) for a in layer_inputs])

    grid_spec = pltpu.PrefetchScalarGridSpec(
        num_scalar_prefetch=0,
        grid=(LAYERS,),
        in_specs=in_specs,
        out_specs=pl.BlockSpec((BATCH, OUT_DIM), lambda l: (0, 0)),
        scratch_shapes=[pltpu.VMEM((BS_P, WIDTH), jnp.float32)],   # resident activation
    )
    return pl.pallas_call(
        _clip_fwd_kernel,
        out_shape=jax.ShapeDtypeStruct((BATCH, OUT_DIM), jnp.float32),
        grid_spec=grid_spec,
        compiler_params=pltpu.CompilerParams(dimension_semantics=("arbitrary",)),
    )(*const_inputs, *layer_inputs)


# ------------------------------ params ----------------------------------------
def init_params(key):
    kit = iter(jax.random.split(key, 64))

    def nrm(shape, scale=0.02):
        return (scale * jax.random.normal(next(kit), shape)).astype(jnp.float32)

    params = {
        "conv_w": nrm((WIDTH, IN_CH, PATCH, PATCH)),   # PyTorch conv1 weight, bias=False
        "class_emb": nrm((WIDTH,)),
        "pos_emb": nrm((SEQ, WIDTH)),
        "ln_pre_g": jnp.ones((WIDTH,), jnp.float32),
        "ln_pre_b": jnp.zeros((WIDTH,), jnp.float32),
        "ln_post_g": jnp.ones((WIDTH,), jnp.float32),
        "ln_post_b": jnp.zeros((WIDTH,), jnp.float32),
        "proj": nrm((WIDTH, OUT_DIM)),
        "blocks": [],
    }
    for _ in range(LAYERS):
        params["blocks"].append({
            "ln1_g": jnp.ones((WIDTH,), jnp.float32),
            "ln1_b": jnp.zeros((WIDTH,), jnp.float32),
            "ln2_g": jnp.ones((WIDTH,), jnp.float32),
            "ln2_b": jnp.zeros((WIDTH,), jnp.float32),
            "in_w": nrm((WIDTH, 3 * WIDTH)),     # in_proj_weight.T (q|k|v columns)
            "in_b": nrm((3 * WIDTH,)),
            "out_w": nrm((WIDTH, WIDTH)),
            "out_b": nrm((WIDTH,)),
            "fc1_w": nrm((WIDTH, MLP_DIM)),
            "fc1_b": nrm((MLP_DIM,)),
            "fc2_w": nrm((MLP_DIM, WIDTH)),
            "fc2_b": nrm((WIDTH,)),
        })
    return params


def stack_layer_weights(blocks):
    def stk(fn):
        return jnp.stack([fn(b) for b in blocks], axis=0)
    return {
        "ln1_g": stk(lambda b: b["ln1_g"][None, :]),
        "ln1_b": stk(lambda b: b["ln1_b"][None, :]),
        # 1/sqrt(head_dim) baked into the Q projection (softmax(q k^T/√d) == softmax((q·s) k^T))
        "wq": stk(lambda b: b["in_w"][:, :WIDTH] * ATTN_SCALE),
        "bq": stk(lambda b: b["in_b"][None, :WIDTH] * ATTN_SCALE),
        "wk": stk(lambda b: b["in_w"][:, WIDTH:2 * WIDTH]),
        "bk": stk(lambda b: b["in_b"][None, WIDTH:2 * WIDTH]),
        "wv": stk(lambda b: b["in_w"][:, 2 * WIDTH:]),
        "bv": stk(lambda b: b["in_b"][None, 2 * WIDTH:]),
        "out_w": stk(lambda b: b["out_w"]),
        "out_b": stk(lambda b: b["out_b"][None, :]),
        "ln2_g": stk(lambda b: b["ln2_g"][None, :]),
        "ln2_b": stk(lambda b: b["ln2_b"][None, :]),
        "fc1_w": stk(lambda b: b["fc1_w"]),
        "fc1_b": stk(lambda b: b["fc1_b"][None, :]),
        "fc2_w": stk(lambda b: b["fc2_w"]),
        "fc2_b": stk(lambda b: b["fc2_b"][None, :]),
    }


# ------------------------------ model ------------------------------------------
def encode_image(image, params):
    """image: [B, C, H, W] (NCHW, like PyTorch) -> [B, OUT_DIM]."""
    B = image.shape[0]
    # conv1 (kernel=stride=PATCH, no bias): patch extraction is host-side layout prep,
    # the matmul itself happens inside the fused kernel (layer==0 branch).
    patches = image.reshape(B, IN_CH, GRID, PATCH, GRID, PATCH)
    patches = patches.transpose(0, 2, 4, 1, 3, 5).reshape(B * N_PATCH, PATCH_DIM)
    conv_w = params["conv_w"].reshape(WIDTH, PATCH_DIM).T

    # seed_add: class_emb + pos[0] at cls rows, pos[t] at patch rows, 0 at pad rows.
    seed_block = jnp.concatenate([
        (params["class_emb"] + params["pos_emb"][0])[None, :],
        params["pos_emb"][1:SEQ],
        jnp.zeros((SEQ_P - SEQ, WIDTH), jnp.float32)], axis=0)       # [SEQ_P, W]
    seed_add = jnp.tile(seed_block, (BATCH, 1))                      # [BS_P, W]

    layer_w = stack_layer_weights(params["blocks"])
    return clip_forward_fused(patches, conv_w, seed_add,
                              params["ln_pre_g"], params["ln_pre_b"],
                              params["ln_post_g"], params["ln_post_b"],
                              params["proj"], layer_w)               # [B, OUT_DIM]


# ------------------------------ pure-JAX reference ------------------------------
def _ref_ln(x, g, b):
    mu = x.mean(-1, keepdims=True)
    var = ((x - mu) ** 2).mean(-1, keepdims=True)
    return (x - mu) / jnp.sqrt(var + LN_EPS) * g + b


def ref_encode_image(image, params):
    B = image.shape[0]
    patches = image.reshape(B, IN_CH, GRID, PATCH, GRID, PATCH)
    patches = patches.transpose(0, 2, 4, 1, 3, 5).reshape(B, N_PATCH, -1)
    x = patches @ params["conv_w"].reshape(WIDTH, -1).T
    cls = jnp.broadcast_to(params["class_emb"][None, None, :], (B, 1, WIDTH))
    x = jnp.concatenate([cls, x], axis=1) + params["pos_emb"][None]
    x = _ref_ln(x, params["ln_pre_g"], params["ln_pre_b"])
    for p in params["blocks"]:
        h = _ref_ln(x, p["ln1_g"], p["ln1_b"])
        qkv = (h @ p["in_w"] + p["in_b"]).reshape(B, SEQ, 3, HEADS, HEAD_DIM)
        q = qkv[:, :, 0].transpose(0, 2, 1, 3)
        k = qkv[:, :, 1].transpose(0, 2, 1, 3)
        v = qkv[:, :, 2].transpose(0, 2, 1, 3)
        s = jnp.einsum("bhqd,bhkd->bhqk", q, k) / np.sqrt(HEAD_DIM)
        a = jax.nn.softmax(s, axis=-1)
        o = jnp.einsum("bhqk,bhkd->bhqd", a, v)
        o = o.transpose(0, 2, 1, 3).reshape(B, SEQ, WIDTH)
        x = x + (o @ p["out_w"] + p["out_b"])
        h = _ref_ln(x, p["ln2_g"], p["ln2_b"])
        h = h @ p["fc1_w"] + p["fc1_b"]
        h = h * jax.nn.sigmoid(1.702 * h)
        x = x + (h @ p["fc2_w"] + p["fc2_b"])
    cls_tok = _ref_ln(x[:, 0, :], params["ln_post_g"], params["ln_post_b"])
    return cls_tok @ params["proj"]


# ------------------------------ main --------------------------------------------
if __name__ == "__main__":
    key = jax.random.PRNGKey(0)
    pkey, xkey = jax.random.split(key)
    params = init_params(pkey)
    image = jax.random.normal(xkey, (BATCH, IN_CH, IMG, IMG), jnp.float32)

    out = jax.block_until_ready(encode_image(image, params))
    assert out.shape == (BATCH, OUT_DIM)

    ref = ref_encode_image(image, params)
    np.testing.assert_allclose(np.asarray(out), np.asarray(ref),
                               rtol=2e-3, atol=2e-3)
    print("KERNEL_OK")
</pallas_src>

<mosaic_0001>
module attributes {stable_mosaic.version = 11 : i64} {
  func.func @_clip_fwd_kernel(%arg0: i32, %arg1: memref<8x192xf32, #tpu.memory_space<vmem>>, %arg2: memref<192x32xf32, #tpu.memory_space<vmem>>, %arg3: memref<16x8xf32, #tpu.memory_space<vmem>>, %arg4: memref<16x32xf32, #tpu.memory_space<vmem>>, %arg5: memref<1x32xf32, #tpu.memory_space<vmem>>, %arg6: memref<1x32xf32, #tpu.memory_space<vmem>>, %arg7: memref<64x16xf32, #tpu.memory_space<vmem>>, %arg8: memref<16x64xf32, #tpu.memory_space<vmem>>, %arg9: memref<64x32xf32, #tpu.memory_space<vmem>>, %arg10: memref<64x64xf32, #tpu.memory_space<vmem>>, %arg11: memref<2x16xf32, #tpu.memory_space<vmem>>, %arg12: memref<1x32xf32, #tpu.memory_space<vmem>>, %arg13: memref<1x32xf32, #tpu.memory_space<vmem>>, %arg14: memref<32x16xf32, #tpu.memory_space<vmem>>, %arg15: memref<1x1x32xf32, #tpu.memory_space<vmem>>, %arg16: memref<1x1x32xf32, #tpu.memory_space<vmem>>, %arg17: memref<1x32x32xf32, #tpu.memory_space<vmem>>, %arg18: memref<1x1x32xf32, #tpu.memory_space<vmem>>, %arg19: memref<1x32x32xf32, #tpu.memory_space<vmem>>, %arg20: memref<1x1x32xf32, #tpu.memory_space<vmem>>, %arg21: memref<1x32x32xf32, #tpu.memory_space<vmem>>, %arg22: memref<1x1x32xf32, #tpu.memory_space<vmem>>, %arg23: memref<1x32x32xf32, #tpu.memory_space<vmem>>, %arg24: memref<1x1x32xf32, #tpu.memory_space<vmem>>, %arg25: memref<1x1x32xf32, #tpu.memory_space<vmem>>, %arg26: memref<1x1x32xf32, #tpu.memory_space<vmem>>, %arg27: memref<1x32x128xf32, #tpu.memory_space<vmem>>, %arg28: memref<1x1x128xf32, #tpu.memory_space<vmem>>, %arg29: memref<1x128x32xf32, #tpu.memory_space<vmem>>, %arg30: memref<1x1x32xf32, #tpu.memory_space<vmem>>, %arg31: memref<2x16xf32, #tpu.memory_space<vmem>>, %arg32: memref<16x32xf32, #tpu.memory_space<vmem>>) attributes {dimension_semantics = [#tpu.dimension_semantics<arbitrary>], iteration_bounds = array<i64: 2>, scalar_prefetch = 0 : i64, scratch_operands = 1 : i64, tpu.core_type = #tpu.core_type<tc>, window_params = [{pipeline_mode = #tpu.pipeline_mode<synchronous>, transform_indices = @transform_0, window_bounds = array<i64: 8, 192>}, {pipeline_mode = #tpu.pipeline_mode<synchronous>, transform_indices = @transform_1, window_bounds = array<i64: 192, 32>}, {pipeline_mode = #tpu.pipeline_mode<synchronous>, transform_indices = @transform_2, window_bounds = array<i64: 16, 8>}, {pipeline_mode = #tpu.pipeline_mode<synchronous>, transform_indices = @transform_3, window_bounds = array<i64: 16, 32>}, {pipeline_mode = #tpu.pipeline_mode<synchronous>, transform_indices = @transform_4, window_bounds = array<i64: 1, 32>}, {pipeline_mode = #tpu.pipeline_mode<synchronous>, transform_indices = @transform_5, window_bounds = array<i64: 1, 32>}, {pipeline_mode = #tpu.pipeline_mode<synchronous>, transform_indices = @transform_6, window_bounds = array<i64: 64, 16>}, {pipeline_mode = #tpu.pipeline_mode<synchronous>, transform_indices = @transform_7, window_bounds = array<i64: 16, 64>}, {pipeline_mode = #tpu.pipeline_mode<synchronous>, transform_indices = @transform_8, window_bounds = array<i64: 64, 32>}, {pipeline_mode = #tpu.pipeline_mode<synchronous>, transform_indices = @transform_9, window_bounds = array<i64: 64, 64>}, {pipeline_mode = #tpu.pipeline_mode<synchronous>, transform_indices = @transform_10, window_bounds = array<i64: 2, 16>}, {pipeline_mode = #tpu.pipeline_mode<synchronous>, transform_indices = @transform_11, window_bounds = array<i64: 1, 32>}, {pipeline_mode = #tpu.pipeline_mode<synchronous>, transform_indices = @transform_12, window_bounds = array<i64: 1, 32>}, {pipeline_mode = #tpu.pipeline_mode<synchronous>, transform_indices = @transform_13, window_bounds = array<i64: 32, 16>}, {transform_indices = @transform_14, window_bounds = array<i64: 1, 1, 32>}, {transform_indices = @transform_15, window_bounds = array<i64: 1, 1, 32>}, {transform_indices = @transform_16, window_bounds = array<i64: 1, 32, 32>}, {transform_indices = @transform_17, window_bounds = array<i64: 1, 1, 32>}, {transform_indices = @transform_18, window_bounds = array<i64: 1, 32, 32>}, {transform_indices = @transform_19, window_bounds = array<i64: 1, 1, 32>}, {transform_indices = @transform_20, window_bounds = array<i64: 1, 32, 32>}, {transform_indices = @transform_21, window_bounds = array<i64: 1, 1, 32>}, {transform_indices = @transform_22, window_bounds = array<i64: 1, 32, 32>}, {transform_indices = @transform_23, window_bounds = array<i64: 1, 1, 32>}, {transform_indices = @transform_24, window_bounds = array<i64: 1, 1, 32>}, {transform_indices = @transform_25, window_bounds = array<i64: 1, 1, 32>}, {transform_indices = @transform_26, window_bounds = array<i64: 1, 32, 128>}, {transform_indices = @transform_27, window_bounds = array<i64: 1, 1, 128>}, {transform_indices = @transform_28, window_bounds = array<i64: 1, 128, 32>}, {transform_indices = @transform_29, window_bounds = array<i64: 1, 1, 32>}, {pipeline_mode = #tpu.pipeline_mode<synchronous>, transform_indices = @transform_30, window_bounds = array<i64: 2, 16>}]} {
    %c0_i32 = arith.constant 0 : i32
    %0 = arith.cmpi eq, %arg0, %c0_i32 : i32
    %1 = arith.extui %0 : i1 to i32
    %c0_i32_0 = arith.constant 0 : i32
    %2 = arith.cmpi ne, %1, %c0_i32_0 : i32
    scf.if %2 {
      %c0_84 = arith.constant 0 : index
      %c0_85 = arith.constant 0 : index
      %133 = vector.load %arg1[%c0_84, %c0_85] : memref<8x192xf32, #tpu.memory_space<vmem>>, vector<8x192xf32>
      %c0_86 = arith.constant 0 : index
      %c0_87 = arith.constant 0 : index
      %134 = vector.load %arg2[%c0_86, %c0_87] : memref<192x32xf32, #tpu.memory_space<vmem>>, vector<192x32xf32>
      %cst_88 = arith.constant dense<0.000000e+00> : vector<8x32xf32>
      %135 = tpu.matmul %133, %134, %cst_88 {dimension_numbers = #tpu.dot_dimension_numbers<[1], [0], [0], [1], [0, 0, 1, 1], [], []>} : vector<8x192xf32>, vector<192x32xf32>, vector<8x32xf32> -> vector<8x32xf32>
      %c0_89 = arith.constant 0 : index
      %c0_90 = arith.constant 0 : index
      %136 = vector.load %arg3[%c0_89, %c0_90] : memref<16x8xf32, #tpu.memory_space<vmem>>, vector<16x8xf32>
      %cst_91 = arith.constant dense<0.000000e+00> : vector<16x32xf32>
      %137 = tpu.matmul %136, %135, %cst_91 {dimension_numbers = #tpu.dot_dimension_numbers<[1], [0], [0], [1], [0, 0, 1, 1], [], []>} : vector<16x8xf32>, vector<8x32xf32>, vector<16x32xf32> -> vector<16x32xf32>
      %c0_92 = arith.constant 0 : index
      %c0_93 = arith.constant 0 : index
      %138 = vector.load %arg4[%c0_92, %c0_93] : memref<16x32xf32, #tpu.memory_space<vmem>>, vector<16x32xf32>
      %139 = arith.addf %137, %138 : vector<16x32xf32>
      %c0_94 = arith.constant 0 : index
      %c0_95 = arith.constant 0 : index
      %140 = vector.load %arg5[%c0_94, %c0_95] : memref<1x32xf32, #tpu.memory_space<vmem>>, vector<1x32xf32>
      %c0_96 = arith.constant 0 : index
      %c0_97 = arith.constant 0 : index
      %141 = vector.load %arg6[%c0_96, %c0_97] : memref<1x32xf32, #tpu.memory_space<vmem>>, vector<1x32xf32>
      %cst_98 = arith.constant dense<0.000000e+00> : vector<16xf32>
      %142 = vector.multi_reduction <add>, %139, %cst_98 [1] : vector<16x32xf32> to vector<16xf32>
      %143 = vector.shape_cast %142 : vector<16xf32> to vector<16x1xf32>
      %cst_99 = arith.constant 3.200000e+01 : f32
      %144 = vector.broadcast %cst_99 : f32 to vector<16x1xf32>
      %145 = arith.divf %143, %144 : vector<16x1xf32>
      %146 = vector.broadcast %145 : vector<16x1xf32> to vector<16x32xf32>
      %147 = arith.subf %139, %146 : vector<16x32xf32>
      %148 = arith.mulf %147, %147 : vector<16x32xf32>
      %cst_100 = arith.constant dense<0.000000e+00> : vector<16xf32>
      %149 = vector.multi_reduction <add>, %148, %cst_100 [1] : vector<16x32xf32> to vector<16xf32>
      %150 = vector.shape_cast %149 : vector<16xf32> to vector<16x1xf32>
      %cst_101 = arith.constant 3.200000e+01 : f32
      %151 = vector.broadcast %cst_101 : f32 to vector<16x1xf32>
      %152 = arith.divf %150, %151 : vector<16x1xf32>
      %153 = vector.broadcast %145 : vector<16x1xf32> to vector<16x32xf32>
      %154 = arith.subf %139, %153 : vector<16x32xf32>
      %cst_102 = arith.constant 9.99999974E-6 : f32
      %155 = vector.broadcast %cst_102 : f32 to vector<16x1xf32>
      %156 = arith.addf %152, %155 : vector<16x1xf32>
      %157 = math.rsqrt %156 : vector<16x1xf32>
      %158 = vector.broadcast %157 : vector<16x1xf32> to vector<16x32xf32>
      %159 = arith.mulf %154, %158 : vector<16x32xf32>
      %160 = vector.broadcast %140 : vector<1x32xf32> to vector<16x32xf32>
      %161 = arith.mulf %159, %160 : vector<16x32xf32>
      %162 = vector.broadcast %141 : vector<1x32xf32> to vector<16x32xf32>
      %163 = arith.addf %161, %162 : vector<16x32xf32>
      %c0_103 = arith.constant 0 : index
      %c0_104 = arith.constant 0 : index
      %164 = vector.load %arg32[%c0_103, %c0_104] : memref<16x32xf32, #tpu.memory_space<vmem>>, vector<16x32xf32>
      tpu.vector_store %arg32[%c0_103, %c0_104], %163 {strides = array<i32>} : memref<16x32xf32, #tpu.memory_space<vmem>>, vector<16x32xf32>,
    } else {
    }
    %c0 = arith.constant 0 : index
    %c0_1 = arith.constant 0 : index
    %3 = vector.load %arg32[%c0, %c0_1] : memref<16x32xf32, #tpu.memory_space<vmem>>, vector<16x32xf32>
    %c0_2 = arith.constant 0 : index
    %c0_3 = arith.constant 0 : index
    %4 = vector.load %arg7[%c0_2, %c0_3] : memref<64x16xf32, #tpu.memory_space<vmem>>, vector<64x16xf32>
    %c0_4 = arith.constant 0 : index
    %c0_5 = arith.constant 0 : index
    %5 = vector.load %arg9[%c0_4, %c0_5] : memref<64x32xf32, #tpu.memory_space<vmem>>, vector<64x32xf32>
    %c0_6 = arith.constant 0 : index
    %c0_7 = arith.constant 0 : index
    %c0_8 = arith.constant 0 : index
    %6 = vector.load %arg15[%c0_6, %c0_7, %c0_8] : memref<1x1x32xf32, #tpu.memory_space<vmem>>, vector<1x1x32xf32>
    %7 = vector.shape_cast %6 : vector<1x1x32xf32> to vector<1x32xf32>
    %c0_9 = arith.constant 0 : index
    %c0_10 = arith.constant 0 : index
    %c0_11 = arith.constant 0 : index
    %8 = vector.load %arg16[%c0_9, %c0_10, %c0_11] : memref<1x1x32xf32, #tpu.memory_space<vmem>>, vector<1x1x32xf32>
    %9 = vector.shape_cast %8 : vector<1x1x32xf32> to vector<1x32xf32>
    %cst = arith.constant dense<0.000000e+00> : vector<16xf32>
    %10 = vector.multi_reduction <add>, %3, %cst [1] : vector<16x32xf32> to vector<16xf32>
    %11 = vector.shape_cast %10 : vector<16xf32> to vector<16x1xf32>
    %cst_12 = arith.constant 3.200000e+01 : f32
    %12 = vector.broadcast %cst_12 : f32 to vector<16x1xf32>
    %13 = arith.divf %11, %12 : vector<16x1xf32>
    %14 = vector.broadcast %13 : vector<16x1xf32> to vector<16x32xf32>
    %15 = arith.subf %3, %14 : vector<16x32xf32>
    %16 = arith.mulf %15, %15 : vector<16x32xf32>
    %cst_13 = arith.constant dense<0.000000e+00> : vector<16xf32>
    %17 = vector.multi_reduction <add>, %16, %cst_13 [1] : vector<16x32xf32> to vector<16xf32>
    %18 = vector.shape_cast %17 : vector<16xf32> to vector<16x1xf32>
    %cst_14 = arith.constant 3.200000e+01 : f32
    %19 = vector.broadcast %cst_14 : f32 to vector<16x1xf32>
    %20 = arith.divf %18, %19 : vector<16x1xf32>
    %21 = vector.broadcast %13 : vector<16x1xf32> to vector<16x32xf32>
    %22 = arith.subf %3, %21 : vector<16x32xf32>
    %cst_15 = arith.constant 9.99999974E-6 : f32
    %23 = vector.broadcast %cst_15 : f32 to vector<16x1xf32>
    %24 = arith.addf %20, %23 : vector<16x1xf32>
    %25 = math.rsqrt %24 : vector<16x1xf32>
    %26 = vector.broadcast %25 : vector<16x1xf32> to vector<16x32xf32>
    %27 = arith.mulf %22, %26 : vector<16x32xf32>
    %28 = vector.broadcast %7 : vector<1x32xf32> to vector<16x32xf32>
    %29 = arith.mulf %27, %28 : vector<16x32xf32>
    %30 = vector.broadcast %9 : vector<1x32xf32> to vector<16x32xf32>
    %31 = arith.addf %29, %30 : vector<16x32xf32>
    %cst_16 = arith.constant dense<0.000000e+00> : vector<64x32xf32>
    %32 = tpu.matmul %4, %31, %cst_16 {dimension_numbers = #tpu.dot_dimension_numbers<[1], [0], [0], [1], [0, 0, 1, 1], [], []>} : vector<64x16xf32>, vector<16x32xf32>, vector<64x32xf32> -> vector<64x32xf32>
    %c0_17 = arith.constant 0 : index
    %c0_18 = arith.constant 0 : index
    %c0_19 = arith.constant 0 : index
    %33 = vector.load %arg17[%c0_17, %c0_18, %c0_19] : memref<1x32x32xf32, #tpu.memory_space<vmem>>, vector<1x32x32xf32>
    %34 = vector.shape_cast %33 : vector<1x32x32xf32> to vector<32x32xf32>
    %cst_20 = arith.constant dense<0.000000e+00> : vector<64x32xf32>
    %35 = tpu.matmul %32, %34, %cst_20 {dimension_numbers = #tpu.dot_dimension_numbers<[1], [0], [0], [1], [0, 0, 1, 1], [], []>} : vector<64x32xf32>, vector<32x32xf32>, vector<64x32xf32> -> vector<64x32xf32>
    %c0_21 = arith.constant 0 : index
    %c0_22 = arith.constant 0 : index
    %c0_23 = arith.constant 0 : index
    %36 = vector.load %arg18[%c0_21, %c0_22, %c0_23] : memref<1x1x32xf32, #tpu.memory_space<vmem>>, vector<1x1x32xf32>
    %37 = vector.shape_cast %36 : vector<1x1x32xf32> to vector<1x32xf32>
    %38 = vector.broadcast %37 : vector<1x32xf32> to vector<64x32xf32>
    %39 = arith.addf %35, %38 : vector<64x32xf32>
    %40 = arith.mulf %39, %5 : vector<64x32xf32>
    %c0_24 = arith.constant 0 : index
    %c0_25 = arith.constant 0 : index
    %c0_26 = arith.constant 0 : index
    %41 = vector.load %arg19[%c0_24, %c0_25, %c0_26] : memref<1x32x32xf32, #tpu.memory_space<vmem>>, vector<1x32x32xf32>
    %42 = vector.shape_cast %41 : vector<1x32x32xf32> to vector<32x32xf32>
    %cst_27 = arith.constant dense<0.000000e+00> : vector<64x32xf32>
    %43 = tpu.matmul %32, %42, %cst_27 {dimension_numbers = #tpu.dot_dimension_numbers<[1], [0], [0], [1], [0, 0, 1, 1], [], []>} : vector<64x32xf32>, vector<32x32xf32>, vector<64x32xf32> -> vector<64x32xf32>
    %c0_28 = arith.constant 0 : index
    %c0_29 = arith.constant 0 : index
    %c0_30 = arith.constant 0 : index
    %44 = vector.load %arg20[%c0_28, %c0_29, %c0_30] : memref<1x1x32xf32, #tpu.memory_space<vmem>>, vector<1x1x32xf32>
    %45 = vector.shape_cast %44 : vector<1x1x32xf32> to vector<1x32xf32>
    %46 = vector.broadcast %45 : vector<1x32xf32> to vector<64x32xf32>
    %47 = arith.addf %43, %46 : vector<64x32xf32>
    %c0_31 = arith.constant 0 : index
    %c0_32 = arith.constant 0 : index
    %c0_33 = arith.constant 0 : index
    %48 = vector.load %arg21[%c0_31, %c0_32, %c0_33] : memref<1x32x32xf32, #tpu.memory_space<vmem>>, vector<1x32x32xf32>
    %49 = vector.shape_cast %48 : vector<1x32x32xf32> to vector<32x32xf32>
    %cst_34 = arith.constant dense<0.000000e+00> : vector<64x32xf32>
    %50 = tpu.matmul %32, %49, %cst_34 {dimension_numbers = #tpu.dot_dimension_numbers<[1], [0], [0], [1], [0, 0, 1, 1], [], []>} : vector<64x32xf32>, vector<32x32xf32>, vector<64x32xf32> -> vector<64x32xf32>
    %c0_35 = arith.constant 0 : index
    %c0_36 = arith.constant 0 : index
    %c0_37 = arith.constant 0 : index
    %51 = vector.load %arg22[%c0_35, %c0_36, %c0_37] : memref<1x1x32xf32, #tpu.memory_space<vmem>>, vector<1x1x32xf32>
    %52 = vector.shape_cast %51 : vector<1x1x32xf32> to vector<1x32xf32>
    %53 = vector.broadcast %52 : vector<1x32xf32> to vector<64x32xf32>
    %54 = arith.addf %50, %53 : vector<64x32xf32>
    %55 = arith.mulf %54, %5 : vector<64x32xf32>
    %cst_38 = arith.constant dense<0.000000e+00> : vector<64x64xf32>
    %56 = tpu.matmul %40, %47, %cst_38 {dimension_numbers = #tpu.dot_dimension_numbers<[1], [1], [0], [0], [0, 0, 1, 0], [], []>} : vector<64x32xf32>, vector<64x32xf32>, vector<64x64xf32> -> vector<64x64xf32>
    %c0_39 = arith.constant 0 : index
    %c0_40 = arith.constant 0 : index
    %57 = vector.load %arg10[%c0_39, %c0_40] : memref<64x64xf32, #tpu.memory_space<vmem>>, vector<64x64xf32>
    %58 = arith.addf %56, %57 : vector<64x64xf32>
    %cst_41 = arith.constant dense<0xFF800000> : vector<64xf32>
    %59 = vector.multi_reduction <maximumf>, %58, %cst_41 [1] : vector<64x64xf32> to vector<64xf32>
    %60 = vector.shape_cast %59 : vector<64xf32> to vector<64x1xf32>
    %61 = vector.broadcast %60 : vector<64x1xf32> to vector<64x64xf32>
    %62 = arith.subf %58, %61 : vector<64x64xf32>
    %63 = math.exp %62 : vector<64x64xf32>
    %cst_42 = arith.constant dense<0.000000e+00> : vector<64xf32>
    %64 = vector.multi_reduction <add>, %63, %cst_42 [1] : vector<64x64xf32> to vector<64xf32>
    %65 = vector.shape_cast %64 : vector<64xf32> to vector<64x1xf32>
    %66 = tpu.reciprocal %65 {approx = true} : vector<64x1xf32> -> vector<64x1xf32>
    %67 = vector.broadcast %66 : vector<64x1xf32> to vector<64x64xf32>
    %68 = arith.mulf %63, %67 : vector<64x64xf32>
    %cst_43 = arith.constant dense<0.000000e+00> : vector<64x32xf32>
    %69 = tpu.matmul %68, %55, %cst_43 {dimension_numbers = #tpu.dot_dimension_numbers<[1], [0], [0], [1], [0, 0, 1, 1], [], []>} : vector<64x64xf32>, vector<64x32xf32>, vector<64x32xf32> -> vector<64x32xf32>
    %c0_44 = arith.constant 0 : index
    %c0_45 = arith.constant 0 : index
    %70 = vector.load %arg8[%c0_44, %c0_45] : memref<16x64xf32, #tpu.memory_space<vmem>>, vector<16x64xf32>
    %cst_46 = arith.constant dense<0.000000e+00> : vector<16x32xf32>
    %71 = tpu.matmul %70, %69, %cst_46 {dimension_numbers = #tpu.dot_dimension_numbers<[1], [0], [0], [1], [0, 0, 1, 1], [], []>} : vector<16x64xf32>, vector<64x32xf32>, vector<16x32xf32> -> vector<16x32xf32>
    %c0_47 = arith.constant 0 : index
    %c0_48 = arith.constant 0 : index
    %c0_49 = arith.constant 0 : index
    %72 = vector.load %arg23[%c0_47, %c0_48, %c0_49] : memref<1x32x32xf32, #tpu.memory_space<vmem>>, vector<1x32x32xf32>
    %73 = vector.shape_cast %72 : vector<1x32x32xf32> to vector<32x32xf32>
    %cst_50 = arith.constant dense<0.000000e+00> : vector<16x32xf32>
    %74 = tpu.matmul %71, %73, %cst_50 {dimension_numbers = #tpu.dot_dimension_numbers<[1], [0], [0], [1], [0, 0, 1, 1], [], []>} : vector<16x32xf32>, vector<32x32xf32>, vector<16x32xf32> -> vector<16x32xf32>
    %75 = arith.addf %3, %74 : vector<16x32xf32>
    %c0_51 = arith.constant 0 : index
    %c0_52 = arith.constant 0 : index
    %c0_53 = arith.constant 0 : index
    %76 = vector.load %arg24[%c0_51, %c0_52, %c0_53] : memref<1x1x32xf32, #tpu.memory_space<vmem>>, vector<1x1x32xf32>
    %77 = vector.shape_cast %76 : vector<1x1x32xf32> to vector<1x32xf32>
    %78 = vector.broadcast %77 : vector<1x32xf32> to vector<16x32xf32>
    %79 = arith.addf %75, %78 : vector<16x32xf32>
    %c0_54 = arith.constant 0 : index
    %c0_55 = arith.constant 0 : index
    %c0_56 = arith.constant 0 : index
    %80 = vector.load %arg25[%c0_54, %c0_55, %c0_56] : memref<1x1x32xf32, #tpu.memory_space<vmem>>, vector<1x1x32xf32>
    %81 = vector.shape_cast %80 : vector<1x1x32xf32> to vector<1x32xf32>
    %c0_57 = arith.constant 0 : index
    %c0_58 = arith.constant 0 : index
    %c0_59 = arith.constant 0 : index
    %82 = vector.load %arg26[%c0_57, %c0_58, %c0_59] : memref<1x1x32xf32, #tpu.memory_space<vmem>>, vector<1x1x32xf32>
    %83 = vector.shape_cast %82 : vector<1x1x32xf32> to vector<1x32xf32>
    %cst_60 = arith.constant dense<0.000000e+00> : vector<16xf32>
    %84 = vector.multi_reduction <add>, %79, %cst_60 [1] : vector<16x32xf32> to vector<16xf32>
    %85 = vector.shape_cast %84 : vector<16xf32> to vector<16x1xf32>
    %cst_61 = arith.constant 3.200000e+01 : f32
    %86 = vector.broadcast %cst_61 : f32 to vector<16x1xf32>
    %87 = arith.divf %85, %86 : vector<16x1xf32>
    %88 = vector.broadcast %87 : vector<16x1xf32> to vector<16x32xf32>
    %89 = arith.subf %79, %88 : vector<16x32xf32>
    %90 = arith.mulf %89, %89 : vector<16x32xf32>
    %cst_62 = arith.constant dense<0.000000e+00> : vector<16xf32>
    %91 = vector.multi_reduction <add>, %90, %cst_62 [1] : vector<16x32xf32> to vector<16xf32>
    %92 = vector.shape_cast %91 : vector<16xf32> to vector<16x1xf32>
    %cst_63 = arith.constant 3.200000e+01 : f32
    %93 = vector.broadcast %cst_63 : f32 to vector<16x1xf32>
    %94 = arith.divf %92, %93 : vector<16x1xf32>
    %95 = vector.broadcast %87 : vector<16x1xf32> to vector<16x32xf32>
    %96 = arith.subf %79, %95 : vector<16x32xf32>
    %cst_64 = arith.constant 9.99999974E-6 : f32
    %97 = vector.broadcast %cst_64 : f32 to vector<16x1xf32>
    %98 = arith.addf %94, %97 : vector<16x1xf32>
    %99 = math.rsqrt %98 : vector<16x1xf32>
    %100 = vector.broadcast %99 : vector<16x1xf32> to vector<16x32xf32>
    %101 = arith.mulf %96, %100 : vector<16x32xf32>
    %102 = vector.broadcast %81 : vector<1x32xf32> to vector<16x32xf32>
    %103 = arith.mulf %101, %102 : vector<16x32xf32>
    %104 = vector.broadcast %83 : vector<1x32xf32> to vector<16x32xf32>
    %105 = arith.addf %103, %104 : vector<16x32xf32>
    %c0_65 = arith.constant 0 : index
    %c0_66 = arith.constant 0 : index
    %c0_67 = arith.constant 0 : index
    %106 = vector.load %arg27[%c0_65, %c0_66, %c0_67] : memref<1x32x128xf32, #tpu.memory_space<vmem>>, vector<1x32x128xf32>
    %107 = vector.shape_cast %106 : vector<1x32x128xf32> to vector<32x128xf32>
    %cst_68 = arith.constant dense<0.000000e+00> : vector<16x128xf32>
    %108 = tpu.matmul %105, %107, %cst_68 {dimension_numbers = #tpu.dot_dimension_numbers<[1], [0], [0], [1], [0, 0, 1, 1], [], []>} : vector<16x32xf32>, vector<32x128xf32>, vector<16x128xf32> -> vector<16x128xf32>
    %c0_69 = arith.constant 0 : index
    %c0_70 = arith.constant 0 : index
    %c0_71 = arith.constant 0 : index
    %109 = vector.load %arg28[%c0_69, %c0_70, %c0_71] : memref<1x1x128xf32, #tpu.memory_space<vmem>>, vector<1x1x128xf32>
    %110 = vector.shape_cast %109 : vector<1x1x128xf32> to vector<1x128xf32>
    %111 = vector.broadcast %110 : vector<1x128xf32> to vector<16x128xf32>
    %112 = arith.addf %108, %111 : vector<16x128xf32>
    %cst_72 = arith.constant 1.702000e+00 : f32
    %113 = vector.broadcast %cst_72 : f32 to vector<16x128xf32>
    %114 = arith.mulf %113, %112 : vector<16x128xf32>
    %115 = arith.negf %114 : vector<16x128xf32>
    %116 = math.exp %115 : vector<16x128xf32>
    %cst_73 = arith.constant 1.000000e+00 : f32
    %117 = vector.broadcast %cst_73 : f32 to vector<16x128xf32>
    %118 = arith.addf %117, %116 : vector<16x128xf32>
    %119 = arith.divf %117, %118 : vector<16x128xf32>
    %120 = arith.mulf %112, %119 : vector<16x128xf32>
    %c0_74 = arith.constant 0 : index
    %c0_75 = arith.constant 0 : index
    %c0_76 = arith.constant 0 : index
    %121 = vector.load %arg29[%c0_74, %c0_75, %c0_76] : memref<1x128x32xf32, #tpu.memory_space<vmem>>, vector<1x128x32xf32>
    %122 = vector.shape_cast %121 : vector<1x128x32xf32> to vector<128x32xf32>
    %cst_77 = arith.constant dense<0.000000e+00> : vector<16x32xf32>
    %123 = tpu.matmul %120, %122, %cst_77 {dimension_numbers = #tpu.dot_dimension_numbers<[1], [0], [0], [1], [0, 0, 1, 1], [], []>} : vector<16x128xf32>, vector<128x32xf32>, vector<16x32xf32> -> vector<16x32xf32>
    %124 = arith.addf %79, %123 : vector<16x32xf32>
    %c0_78 = arith.constant 0 : index
    %c0_79 = arith.constant 0 : index
    %c0_80 = arith.constant 0 : index
    %125 = vector.load %arg30[%c0_78, %c0_79, %c0_80] : memref<1x1x32xf32, #tpu.memory_space<vmem>>, vector<1x1x32xf32>
    %126 = vector.shape_cast %125 : vector<1x1x32xf32> to vector<1x32xf32>
    %127 = vector.broadcast %126 : vector<1x32xf32> to vector<16x32xf32>
    %128 = arith.addf %124, %127 : vector<16x32xf32>
    %c0_81 = arith.constant 0 : index
    %c0_82 = arith.constant 0 : index
    %129 = vector.load %arg32[%c0_81, %c0_82] : memref<16x32xf32, #tpu.memory_space<vmem>>, vector<16x32xf32>
    tpu.vector_store %arg32[%c0_81, %c0_82], %128 {strides = array<i32>} : memref<16x32xf32, #tpu.memory_space<vmem>>, vector<16x32xf32>,
    %c1_i32 = arith.constant 1 : i32
    %130 = arith.cmpi eq, %arg0, %c1_i32 : i32
    %131 = arith.extui %130 : i1 to i32
    %c0_i32_83 = arith.constant 0 : i32
    %132 = arith.cmpi ne, %131, %c0_i32_83 : i32
    scf.if %132 {
      %c0_84 = arith.constant 0 : index
      %c0_85 = arith.constant 0 : index
      %133 = vector.load %arg11[%c0_84, %c0_85] : memref<2x16xf32, #tpu.memory_space<vmem>>, vector<2x16xf32>
      %cst_86 = arith.constant dense<0.000000e+00> : vector<2x32xf32>
      %134 = tpu.matmul %133, %128, %cst_86 {dimension_numbers = #tpu.dot_dimension_numbers<[1], [0], [0], [1], [0, 0, 1, 1], [], []>} : vector<2x16xf32>, vector<16x32xf32>, vector<2x32xf32> -> vector<2x32xf32>
      %c0_87 = arith.constant 0 : index
      %c0_88 = arith.constant 0 : index
      %135 = vector.load %arg12[%c0_87, %c0_88] : memref<1x32xf32, #tpu.memory_space<vmem>>, vector<1x32xf32>
      %c0_89 = arith.constant 0 : index
      %c0_90 = arith.constant 0 : index
      %136 = vector.load %arg13[%c0_89, %c0_90] : memref<1x32xf32, #tpu.memory_space<vmem>>, vector<1x32xf32>
      %cst_91 = arith.constant dense<0.000000e+00> : vector<2xf32>
      %137 = vector.multi_reduction <add>, %134, %cst_91 [1] : vector<2x32xf32> to vector<2xf32>
      %138 = vector.shape_cast %137 : vector<2xf32> to vector<2x1xf32>
      %cst_92 = arith.constant 3.200000e+01 : f32
      %139 = vector.broadcast %cst_92 : f32 to vector<2x1xf32>
      %140 = arith.divf %138, %139 : vector<2x1xf32>
      %141 = vector.broadcast %140 : vector<2x1xf32> to vector<2x32xf32>
      %142 = arith.subf %134, %141 : vector<2x32xf32>
      %143 = arith.mulf %142, %142 : vector<2x32xf32>
      %cst_93 = arith.constant dense<0.000000e+00> : vector<2xf32>
      %144 = vector.multi_reduction <add>, %143, %cst_93 [1] : vector<2x32xf32> to vector<2xf32>
      %145 = vector.shape_cast %144 : vector<2xf32> to vector<2x1xf32>
      %cst_94 = arith.constant 3.200000e+01 : f32
      %146 = vector.broadcast %cst_94 : f32 to vector<2x1xf32>
      %147 = arith.divf %145, %146 : vector<2x1xf32>
      %148 = vector.broadcast %140 : vector<2x1xf32> to vector<2x32xf32>
      %149 = arith.subf %134, %148 : vector<2x32xf32>
      %cst_95 = arith.constant 9.99999974E-6 : f32
      %150 = vector.broadcast %cst_95 : f32 to vector<2x1xf32>
      %151 = arith.addf %147, %150 : vector<2x1xf32>
      %152 = math.rsqrt %151 : vector<2x1xf32>
      %153 = vector.broadcast %152 : vector<2x1xf32> to vector<2x32xf32>
      %154 = arith.mulf %149, %153 : vector<2x32xf32>
      %155 = vector.broadcast %135 : vector<1x32xf32> to vector<2x32xf32>
      %156 = arith.mulf %154, %155 : vector<2x32xf32>
      %157 = vector.broadcast %136 : vector<1x32xf32> to vector<2x32xf32>
      %158 = arith.addf %156, %157 : vector<2x32xf32>
      %c0_96 = arith.constant 0 : index
      %c0_97 = arith.constant 0 : index
      %159 = vector.load %arg14[%c0_96, %c0_97] : memref<32x16xf32, #tpu.memory_space<vmem>>, vector<32x16xf32>
      %cst_98 = arith.constant dense<0.000000e+00> : vector<2x16xf32>
      %160 = tpu.matmul %158, %159, %cst_98 {dimension_numbers = #tpu.dot_dimension_numbers<[1], [0], [0], [1], [0, 0, 1, 1], [], []>} : vector<2x32xf32>, vector<32x16xf32>, vector<2x16xf32> -> vector<2x16xf32>
      %c0_99 = arith.constant 0 : index
      %c0_100 = arith.constant 0 : index
      %161 = vector.load %arg31[%c0_99, %c0_100] : memref<2x16xf32, #tpu.memory_space<vmem>>, vector<2x16xf32>
      tpu.vector_store %arg31[%c0_99, %c0_100], %160 {strides = array<i32>} : memref<2x16xf32, #tpu.memory_space<vmem>>, vector<2x16xf32>,
    } else {
    }
    return
  }
  func.func @transform_0(%arg0: i32) -> (i32, i32) {
    %c0_i32 = arith.constant 0 : i32
    %c0_i32_0 = arith.constant 0 : i32
    %c0_i32_1 = arith.constant 0 : i32
    return %c0_i32, %c0_i32_0 : i32, i32
  }
  func.func @transform_1(%arg0: i32) -> (i32, i32) {
    %c0_i32 = arith.constant 0 : i32
    %c0_i32_0 = arith.constant 0 : i32
    %c0_i32_1 = arith.constant 0 : i32
    return %c0_i32, %c0_i32_0 : i32, i32
  }
  func.func @transform_2(%arg0: i32) -> (i32, i32) {
    %c0_i32 = arith.constant 0 : i32
    %c0_i32_0 = arith.constant 0 : i32
    %c0_i32_1 = arith.constant 0 : i32
    return %c0_i32, %c0_i32_0 : i32, i32
  }
  func.func @transform_3(%arg0: i32) -> (i32, i32) {
    %c0_i32 = arith.constant 0 : i32
    %c0_i32_0 = arith.constant 0 : i32
    %c0_i32_1 = arith.constant 0 : i32
    return %c0_i32, %c0_i32_0 : i32, i32
  }
  func.func @transform_4(%arg0: i32) -> (i32, i32) {
    %c0_i32 = arith.constant 0 : i32
    %c0_i32_0 = arith.constant 0 : i32
    %c0_i32_1 = arith.constant 0 : i32
    return %c0_i32, %c0_i32_0 : i32, i32
  }
  func.func @transform_5(%arg0: i32) -> (i32, i32) {
    %c0_i32 = arith.constant 0 : i32
    %c0_i32_0 = arith.constant 0 : i32
    %c0_i32_1 = arith.constant 0 : i32
    return %c0_i32, %c0_i32_0 : i32, i32
  }
  func.func @transform_6(%arg0: i32) -> (i32, i32) {
    %c0_i32 = arith.constant 0 : i32
    %c0_i32_0 = arith.constant 0 : i32
    %c0_i32_1 = arith.constant 0 : i32
    return %c0_i32, %c0_i32_0 : i32, i32
  }
  func.func @transform_7(%arg0: i32) -> (i32, i32) {
    %c0_i32 = arith.constant 0 : i32
    %c0_i32_0 = arith.constant 0 : i32
    %c0_i32_1 = arith.constant 0 : i32
    return %c0_i32, %c0_i32_0 : i32, i32
  }
  func.func @transform_8(%arg0: i32) -> (i32, i32) {
    %c0_i32 = arith.constant 0 : i32
    %c0_i32_0 = arith.constant 0 : i32
    %c0_i32_1 = arith.constant 0 : i32
    return %c0_i32, %c0_i32_0 : i32, i32
  }
  func.func @transform_9(%arg0: i32) -> (i32, i32) {
    %c0_i32 = arith.constant 0 : i32
    %c0_i32_0 = arith.constant 0 : i32
    %c0_i32_1 = arith.constant 0 : i32
    return %c0_i32, %c0_i32_0 : i32, i32
  }
  func.func @transform_10(%arg0: i32) -> (i32, i32) {
    %c0_i32 = arith.constant 0 : i32
    %c0_i32_0 = arith.constant 0 : i32
    %c0_i32_1 = arith.constant 0 : i32
    return %c0_i32, %c0_i32_0 : i32, i32
  }
  func.func @transform_11(%arg0: i32) -> (i32, i32) {
    %c0_i32 = arith.constant 0 : i32
    %c0_i32_0 = arith.constant 0 : i32
    %c0_i32_1 = arith.constant 0 : i32
    return %c0_i32, %c0_i32_0 : i32, i32
  }
  func.func @transform_12(%arg0: i32) -> (i32, i32) {
    %c0_i32 = arith.constant 0 : i32
    %c0_i32_0 = arith.constant 0 : i32
    %c0_i32_1 = arith.constant 0 : i32
    return %c0_i32, %c0_i32_0 : i32, i32
  }
  func.func @transform_13(%arg0: i32) -> (i32, i32) {
    %c0_i32 = arith.constant 0 : i32
    %c0_i32_0 = arith.constant 0 : i32
    %c0_i32_1 = arith.constant 0 : i32
    return %c0_i32, %c0_i32_0 : i32, i32
  }
  func.func @transform_14(%arg0: i32) -> (i32, i32, i32) {
    %c0_i32 = arith.constant 0 : i32
    %c0_i32_0 = arith.constant 0 : i32
    %c0_i32_1 = arith.constant 0 : i32
    return %arg0, %c0_i32, %c0_i32_0 : i32, i32, i32
  }
  func.func @transform_15(%arg0: i32) -> (i32, i32, i32) {
    %c0_i32 = arith.constant 0 : i32
    %c0_i32_0 = arith.constant 0 : i32
    %c0_i32_1 = arith.constant 0 : i32
    return %arg0, %c0_i32, %c0_i32_0 : i32, i32, i32
  }
  func.func @transform_16(%arg0: i32) -> (i32, i32, i32) {
    %c0_i32 = arith.constant 0 : i32
    %c0_i32_0 = arith.constant 0 : i32
    %c0_i32_1 = arith.constant 0 : i32
    return %arg0, %c0_i32, %c0_i32_0 : i32, i32, i32
  }
  func.func @transform_17(%arg0: i32) -> (i32, i32, i32) {
    %c0_i32 = arith.constant 0 : i32
    %c0_i32_0 = arith.constant 0 : i32
    %c0_i32_1 = arith.constant 0 : i32
    return %arg0, %c0_i32, %c0_i32_0 : i32, i32, i32
  }
  func.func @transform_18(%arg0: i32) -> (i32, i32, i32) {
    %c0_i32 = arith.constant 0 : i32
    %c0_i32_0 = arith.constant 0 : i32
    %c0_i32_1 = arith.constant 0 : i32
    return %arg0, %c0_i32, %c0_i32_0 : i32, i32, i32
  }
  func.func @transform_19(%arg0: i32) -> (i32, i32, i32) {
    %c0_i32 = arith.constant 0 : i32
    %c0_i32_0 = arith.constant 0 : i32
    %c0_i32_1 = arith.constant 0 : i32
    return %arg0, %c0_i32, %c0_i32_0 : i32, i32, i32
  }
  func.func @transform_20(%arg0: i32) -> (i32, i32, i32) {
    %c0_i32 = arith.constant 0 : i32
    %c0_i32_0 = arith.constant 0 : i32
    %c0_i32_1 = arith.constant 0 : i32
    return %arg0, %c0_i32, %c0_i32_0 : i32, i32, i32
  }
  func.func @transform_21(%arg0: i32) -> (i32, i32, i32) {
    %c0_i32 = arith.constant 0 : i32
    %c0_i32_0 = arith.constant 0 : i32
    %c0_i32_1 = arith.constant 0 : i32
    return %arg0, %c0_i32, %c0_i32_0 : i32, i32, i32
  }
  func.func @transform_22(%arg0: i32) -> (i32, i32, i32) {
    %c0_i32 = arith.constant 0 : i32
    %c0_i32_0 = arith.constant 0 : i32
    %c0_i32_1 = arith.constant 0 : i32
    return %arg0, %c0_i32, %c0_i32_0 : i32, i32, i32
  }
  func.func @transform_23(%arg0: i32) -> (i32, i32, i32) {
    %c0_i32 = arith.constant 0 : i32
    %c0_i32_0 = arith.constant 0 : i32
    %c0_i32_1 = arith.constant 0 : i32
    return %arg0, %c0_i32, %c0_i32_0 : i32, i32, i32
  }
  func.func @transform_24(%arg0: i32) -> (i32, i32, i32) {
    %c0_i32 = arith.constant 0 : i32
    %c0_i32_0 = arith.constant 0 : i32
    %c0_i32_1 = arith.constant 0 : i32
    return %arg0, %c0_i32, %c0_i32_0 : i32, i32, i32
  }
  func.func @transform_25(%arg0: i32) -> (i32, i32, i32) {
    %c0_i32 = arith.constant 0 : i32
    %c0_i32_0 = arith.constant 0 : i32
    %c0_i32_1 = arith.constant 0 : i32
    return %arg0, %c0_i32, %c0_i32_0 : i32, i32, i32
  }
  func.func @transform_26(%arg0: i32) -> (i32, i32, i32) {
    %c0_i32 = arith.constant 0 : i32
    %c0_i32_0 = arith.constant 0 : i32
    %c0_i32_1 = arith.constant 0 : i32
    return %arg0, %c0_i32, %c0_i32_0 : i32, i32, i32
  }
  func.func @transform_27(%arg0: i32) -> (i32, i32, i32) {
    %c0_i32 = arith.constant 0 : i32
    %c0_i32_0 = arith.constant 0 : i32
    %c0_i32_1 = arith.constant 0 : i32
    return %arg0, %c0_i32, %c0_i32_0 : i32, i32, i32
  }
  func.func @transform_28(%arg0: i32) -> (i32, i32, i32) {
    %c0_i32 = arith.constant 0 : i32
    %c0_i32_0 = arith.constant 0 : i32
    %c0_i32_1 = arith.constant 0 : i32
    return %arg0, %c0_i32, %c0_i32_0 : i32, i32, i32
  }
  func.func @transform_29(%arg0: i32) -> (i32, i32, i32) {
    %c0_i32 = arith.constant 0 : i32
    %c0_i32_0 = arith.constant 0 : i32
    %c0_i32_1 = arith.constant 0 : i32
    return %arg0, %c0_i32, %c0_i32_0 : i32, i32, i32
  }
  func.func @transform_30(%arg0: i32) -> (i32, i32) {
    %c0_i32 = arith.constant 0 : i32
    %c0_i32_0 = arith.constant 0 : i32
    %c0_i32_1 = arith.constant 0 : i32
    return %c0_i32, %c0_i32_0 : i32, i32
  }
}

</mosaic_0001>

<bundles_post_ra>
// kernel: tpu_custom_call.1
= control target key start
LH: loop header
LB: loop body
LE: loop exit
PB: predicated region body
PF: predicated region fallthrough
CT: control target
= control target key end

     0   :  { %s3993_s6 = smov 1   ;;  %s3994_s10 = smov 2   ;;  %s4569_s0 = inlined_call_operand.smem [shape: u32[31], index: -1, kind: input, shape index: {}] }
   0x1   :  { %s4036_s5 = sld [smem:[%s4569_s0]]   ;;  %s3995_s14 = smov 3  }
   0x2   :  { %s4041_s9 = sld [smem:[%s4569_s0 + %s3993_s6]]   ;;  %s3996_s18 = smov 4  }
   0x3   :  { %s4046_s13 = sld [smem:[%s4569_s0 + %s3994_s10]]   ;;  %s3997_s22 = smov 5  }
   0x4   :  { %s4051_s17 = sld [smem:[%s4569_s0 + %s3995_s14]]   ;;  %s3998_s26 = smov 6  }
   0x5   :  { %s4056_s21 = sld [smem:[%s4569_s0 + %s3996_s18]]   ;;  %s3999_s30 = smov 7  }
   0x6   :  { %s4061_s25 = sld [smem:[%s4569_s0 + %s3997_s22]]   ;;  %s4000_s4 = smov 8  }
   0x7   :  { %4581 = sst [smem:[#allocation6_spill]] %s4036_s5  ;;  %s4001_s10 = smov 9  }
   0x8   :  { %4582 = sst [smem:[#allocation7_spill]] %s4041_s9  ;;  %s4002_s15 = smov 10  }
   0x9   :  { %4583 = sst [smem:[#allocation8_spill]] %s4046_s13  ;;  %s4003_s20 = smov 11  }
   0xa   :  { %4584 = sst [smem:[#allocation9_spill]] %s4051_s17  ;;  %s4005_s1 = smov 13  }
   0xb   :  { %4585 = sst [smem:[#allocation10_spill]] %s4056_s21  ;;  %s4006_s7 = smov 14  }
   0xc   :  { %4586 = sst [smem:[#allocation11_spill]] %s4061_s25  ;;  %s4008_s22 = smov 16  }
   0xd   :  { %s4066_s29 = sld [smem:[%s4569_s0 + %s3998_s26]]   ;;  %s4004_s26 = smov 12  }
   0xe   :  { %s4071_s3 = sld [smem:[%s4569_s0 + %s3999_s30]]   ;;  %s4009_s28 = smov 17  }
   0xf   :  { %s4076_s8 = sld [smem:[%s4569_s0 + %s4000_s4]]  }
  0x10   :  { %s4081_s14 = sld [smem:[%s4569_s0 + %s4001_s10]]  }
  0x11   :  { %s4086_s19 = sld [smem:[%s4569_s0 + %s4002_s15]]   ;;  %s4007_s15 = smov 15  }
  0x12   :  { %s4091_s24 = sld [smem:[%s4569_s0 + %s4003_s20]]  }
  0x13   :  { %4587 = sst [smem:[#allocation12_spill]] %s4066_s29 }
  0x14   :  { %4588 = sst [smem:[#allocation13_spill]] %s4071_s3 }
  0x15   :  { %4589 = sst [smem:[#allocation14_spill]] %s4076_s8 }
  0x16   :  { %4590 = sst [smem:[#allocation15_spill]] %s4081_s14 }
  0x17   :  { %4591 = sst [smem:[#allocation16_spill]] %s4086_s19 }
  0x18   :  { %4592 = sst [smem:[#allocation17_spill]] %s4091_s24 }
  0x19   :  { %s4096_s30 = sld [smem:[%s4569_s0 + %s4004_s26]]  }
  0x1a   :  { %s4101_s6 = sld [smem:[%s4569_s0 + %s4005_s1]]  }
  0x1b   :  { %s4106_s12 = sld [smem:[%s4569_s0 + %s4006_s7]]   ;;  %s4010_s7 = smov 18  }
  0x1c   :  { %s4111_s20 = sld [smem:[%s4569_s0 + %s4007_s15]]   ;;  %s4011_s15 = smov 19  }
  0x1d   :  { %s4116_s27 = sld [smem:[%s4569_s0 + %s4008_s22]]   ;;  %s4012_s22 = smov 20  }
  0x1e   :  { %s4121_s4 = sld [smem:[%s4569_s0 + %s4009_s28]]   ;;  %s4013_s28 = smov 21  }
  0x1f   :  { %4593 = sst [smem:[#allocation18_spill]] %s4096_s30 }
  0x20   :  { %4594 = sst [smem:[#allocation19_spill]] %s4101_s6 }
  0x21   :  { %4595 = sst [smem:[#allocation20_spill]] %s4106_s12 }
  0x22   :  { %4596 = sst [smem:[#allocation21_spill]] %s4111_s20 }
  0x23   :  { %4597 = sst [smem:[#allocation22_spill]] %s4116_s27 }
  0x24   :  { %s4126_s30 = sld [smem:[%s4569_s0 + %s4010_s7]]   ;;  %s4014_s7 = smov 22  }
  0x25   :  { %s4131_s24 = sld [smem:[%s4569_s0 + %s4011_s15]]   ;;  %s4015_s15 = smov 23  }
  0x26   :  { %s4136_s6 = sld [smem:[%s4569_s0 + %s4012_s22]]   ;;  %s4016_s22 = smov 24  }
  0x27   :  { %s4141_s19 = sld [smem:[%s4569_s0 + %s4013_s28]]   ;;  %s4017_s28 = smov 25  }
  0x28   :  { %s4146_s3 = sld [smem:[%s4569_s0 + %s4014_s7]]   ;;  %s4018_s7 = smov 26  }
  0x29   :  { %s4151_s14 = sld [smem:[%s4569_s0 + %s4015_s15]]   ;;  %s4019_s15 = smov 27  }
  0x2a   :  { %s4156_s8 = sld [smem:[%s4569_s0 + %s4016_s22]]   ;;  %s4020_s22 = smov 28  }
  0x2b   :  { %s4161_s29 = sld [smem:[%s4569_s0 + %s4017_s28]]   ;;  %s4021_s28 = smov 29  }
  0x2c   :  { %s4166_s25 = sld [smem:[%s4569_s0 + %s4018_s7]]   ;;  %s4022_s7 = smov 30  }
  0x2d   :  { %s4171_s21 = sld [smem:[%s4569_s0 + %s4019_s15]]  }
  0x2e   :  { %s4176_s17 = sld [smem:[%s4569_s0 + %s4020_s22]]  }
  0x2f   :  { %s4181_s13 = sld [smem:[%s4569_s0 + %s4021_s28]]  }
  0x30   :  { %s4186_s5 = sld [smem:[%s4569_s0 + %s4022_s7]]  }
  0x36   :  { %4598 = sst [smem:[#allocation23_spill]] %s4186_s5 }
  0x37   :  { %66 = vsyncpa [#allocation4], 0  ;;  %s4188_s15 = smov 0  }
  0x38 LB: > { %4599 = sst [smem:[#allocation24_spill]] %s3991_s15  ;;  %s4194_s16 = sadd.s32 4294967295, %s3991_s15   ;;  %s3991_s15 = sphi %s4188_s15, %s72_s15  }
  0x39   : > { %p3207_p0 = scmp.ge.s32.totalorder %s3991_s15, 1  ;;  %p969_p1 = scmp.lt.s32.totalorder %s3991_s15, 3 }
  0x3b   : > { %p970_p2 = pnand %p3207_p0, %p969_p1 }
  0x3c   : > { %s4602_s27 = sld [smem:[#allocation22_spill]] (!%p970_p2)  ;;  %p1097_p3 = scmp.lt.s32.totalorder (!%p970_p2), %s4194_s16, 1 }
  0x3d   : > { %973 = sbr.rel (%p970_p2) target bundleno = 4425 (0x1149), region = 140  ;;  %p3220_p4 = scmp.ne.s32.totalorder (!%p970_p2), %s4194_s16, 0 }
  0x44   : > { %s4200_s0 = scalar_select %p1097_p3, %s4194_s16, 1 }
  0x45   : > { %1160 = sbr.rel (%p3220_p4) target bundleno = 877 (0x36d), region = 144  ;;  %v4023_v3 = vmov (!%p3220_p4), 0.0|0.0   ;;  %vm1187_vm0 = vcmask (!%p3220_p4), 523264   ;;  %s4606_s26 = sld [smem:[#allocation9_spill]] (!%p3220_p4)  ;;  %vm1265_vm1 = vcmask (!%p3220_p4), 64512   ;;  %vm1349_vm2 = vcmask (!%p3220_p4), 261120  }
  0x46   : > { %s3309_s23 = sshll.u32 %s4200_s0, 5  ;;  %s1118_s2 = scalar_lea.vmem %s4131_s24, %s4200_s0  ;;  %3675 = vmatprep.subr.bf16.mxu0 (!%p3220_p4), %v4023_v3 }
  0x47   : > { %s4210_s28 = scalar_lea.vmem %s4602_s27, %s3309_s23  ;;  %s4213_s1 = scalar_lea.vmem %s4126_s30, %s3309_s23 }
  0x48   : > { %s4218_s7 = scalar_lea.vmem %s4136_s6, %s3309_s23  ;;  %s1126_s10 = scalar_lea.vmem %s4141_s19, %s4200_s0 }
  0x49   : > { %s4223_s11 = scalar_lea.vmem %s4146_s3, %s3309_s23  ;;  %s4232_s18 = scalar_lea.vmem %s4166_s25, %s3309_s23 }
  0x4a   : > { %s3314_s20 = sshll.u32 %s4200_s0, 7  ;;  %s4603_s27 = sld [smem:[#allocation7_spill]] (!%p3220_p4) }
  0x4b   : > { %s4238_s12 = scalar_lea.vmem %s4176_s17, %s3314_s20  ;;  %s4604_s23 = sld [smem:[#allocation6_spill]] (!%p3220_p4)  ;;  %v1263_v43 = vld [vmem:[%s4606_s26] sm:$0xff] (!%p3220_p4)  ;;  %v1264_v45 = vld [vmem:[%s4606_s26 + $0x8] sm:$0xff] (!%p3220_p4) }
  0x4c   : > { %s4605_s20 = sld [smem:[#allocation8_spill]]  ;;  %s4607_s22 = sld [smem:[#allocation10_spill]] }
  0x4d   : > { %s4608_s9 = sld [smem:[#allocation11_spill]] }
  0x50   : > { %v1163_v0 = vld [vmem:[%s4603_s27] sm:$0xff]  ;;  %v1164_v1 = vld [vmem:[%s4603_s27 + $0x8] sm:$0xff]  ;;  %v1165_v2 = vld [vmem:[%s4603_s27 + $0x10] sm:$0xff] }
  0x51   : > { %v3676_v4 = vpack.c.bf16 %v1164_v1, %v1163_v0  ;;  %v1166_v5 = vld [vmem:[%s4603_s27 + $0x18] sm:$0xff]  ;;  %v1167_v7 = vld [vmem:[%s4603_s27 + $0x20] sm:$0xff]  ;;  %v1168_v8 = vld [vmem:[%s4603_s27 + $0x28] sm:$0xff] }
  0x52   : > { %v3679_v6 = vpack.c.bf16 %v1166_v5, %v1165_v2  ;;  %v3682_v9 = vpack.c.bf16 %v1168_v8, %v1167_v7  ;;  %v1169_v10 = vld [vmem:[%s4603_s27 + $0x30] sm:$0xff]  ;;  %v1170_v11 = vld [vmem:[%s4603_s27 + $0x38] sm:$0xff]  ;;  %v1162_v12 = vld [vmem:[%s4604_s23 + $0x8] sm:$0xff] }
  0x53   : > { %3677 = vmatpush1.bf16.msra.mxu0 %v3676_v4  ;;  %3221 = vmatprep.mubr.msk.f32.mxu0 %vm1187_vm0, %v1162_v12  ;;  %v3685_v13 = vpack.c.bf16 %v1170_v11, %v1169_v10  ;;  %v1171_v14 = vld [vmem:[%s4603_s27 + $0x40] sm:$0xff]  ;;  %v1172_v15 = vld [vmem:[%s4603_s27 + $0x48] sm:$0xff]  ;;  %v1173_v17 = vld [vmem:[%s4603_s27 + $0x50] sm:$0xff] }
  0x54   : > { %3678 = vmatprep.subr.bf16.mxu0 %v4023_v3  ;;  %v3688_v16 = vpack.c.bf16 %v1172_v15, %v1171_v14  ;;  %v1174_v18 = vld [vmem:[%s4603_s27 + $0x58] sm:$0xff]  ;;  %v1175_v20 = vld [vmem:[%s4603_s27 + $0x60] sm:$0xff]  ;;  %v1176_v21 = vld [vmem:[%s4603_s27 + $0x68] sm:$0xff] }
  0x55   : > { %v3691_v19 = vpack.c.bf16 %v1174_v18, %v1173_v17  ;;  %v3694_v22 = vpack.c.bf16 %v1176_v21, %v1175_v20  ;;  %v1177_v23 = vld [vmem:[%s4603_s27 + $0x70] sm:$0xff]  ;;  %v1178_v24 = vld [vmem:[%s4603_s27 + $0x78] sm:$0xff]  ;;  %v1179_v26 = vld [vmem:[%s4603_s27 + $0x80] sm:$0xff] }
  0x56   : > { %v3697_v25 = vpack.c.bf16 %v1178_v24, %v1177_v23  ;;  %v1180_v27 = vld [vmem:[%s4603_s27 + $0x88] sm:$0xff]  ;;  %v1181_v29 = vld [vmem:[%s4603_s27 + $0x90] sm:$0xff]  ;;  %v1182_v30 = vld [vmem:[%s4603_s27 + $0x98] sm:$0xff] }
  0x57   : > { %3680 = vmatpush1.bf16.msra.mxu0 %v3679_v6  ;;  %v3700_v28 = vpack.c.bf16 %v1180_v27, %v1179_v26  ;;  %v3703_v31 = vpack.c.bf16 %v1182_v30, %v1181_v29  ;;  %v1183_v32 = vld [vmem:[%s4603_s27 + $0xa0] sm:$0xff]  ;;  %v1184_v33 = vld [vmem:[%s4603_s27 + $0xa8] sm:$0xff]  ;;  %v1185_v35 = vld [vmem:[%s4603_s27 + $0xb0] sm:$0xff] }
  0x58   : > { %3681 = vmatprep.subr.bf16.mxu0 %v4023_v3  ;;  %v3706_v34 = vpack.c.bf16 %v1184_v33, %v1183_v32  ;;  %v1186_v36 = vld [vmem:[%s4603_s27 + $0xb8] sm:$0xff]  ;;  %v1161_v38 = vld [vmem:[%s4604_s23] sm:$0xff]  ;;  %v1262_v41 = vld [vmem:[%s4605_s20 + $0x8] sm:$0xff] }
  0x59   : > { %v3709_v37 = vpack.c.bf16 %v1186_v36, %v1185_v35  ;;  %v1261_v39 = vld [vmem:[%s4605_s20] sm:$0xff] }
  0x5a   : > { %3446 = vmatprep.mubr.msk.f32.mxu1 %vm1265_vm1, %v1261_v39  ;;  %v3224_v4 = vld [vmem:[%s4607_s22] ss:$0 sm:$0xff] }
  0x5b   : > { %3683 = vmatpush1.bf16.msra.mxu0 %v3682_v9  ;;  %v3225_v6 = vld [vmem:[%s4608_s9] ss:$0 sm:$0xff] }
  0x5c   : > { %3684 = vmatprep.subr.bf16.mxu0 %v4023_v3 }
  0x5f   : > { %3686 = vmatpush1.bf16.msra.mxu0 %v3685_v13 }
  0x60   : > { %3687 = vmatprep.subr.bf16.mxu0 %v4023_v3 }
  0x63   : > { %3689 = vmatpush1.bf16.msra.mxu0 %v3688_v16 }
  0x64   : > { %3690 = vmatprep.subr.bf16.mxu0 %v4023_v3 }
  0x67   : > { %3692 = vmatpush1.bf16.msra.mxu0 %v3691_v19 }
  0x68   : > { %3693 = vmatprep.subr.bf16.mxu0 %v4023_v3 }
  0x6b   : > { %3695 = vmatpush1.bf16.msra.mxu0 %v3694_v22 }
  0x6c   : > { %3696 = vmatprep.subr.bf16.mxu0 %v4023_v3 }
  0x6f   : > { %3698 = vmatpush1.bf16.msra.mxu0 %v3697_v25 }
  0x70   : > { %3699 = vmatprep.subr.bf16.mxu0 %v4023_v3 }
  0x73   : > { %3701 = vmatpush1.bf16.msra.mxu0 %v3700_v28 }
  0x74   : > { %3702 = vmatprep.subr.bf16.mxu0 %v4023_v3 }
  0x77   : > { %3704 = vmatpush1.bf16.msra.mxu0 %v3703_v31 }
  0x78   : > { %3705 = vmatprep.subr.bf16.mxu0 %v4023_v3 }
  0x7b   : > { %3707 = vmatpush1.bf16.msra.mxu0 %v3706_v34 }
  0x7c   : > { %3708 = vmatprep.subr.bf16.mxu0 %v4023_v3 }
  0x7f   : > { %3710 = vmatpush1.bf16.msra.mxu0 %v3709_v37 }
  0x82   : > { %1256 = vmatmul.mubr.f32.vlgmr.msra.gmra.mrb[0].mxu0 %v1161_v38 }
 0x155   : > { %v1257_v40 = vpop.f32.mrb[0].mxu0 }
 0x156   : > { %v1259_v42 = vpop.f32.mrb[1].mxu0  ;;  %3444 = vmatprep.subr.mxu1 %v1257_v40 }
 0x157   : > { %3445 = vmatpush3.msra.mxu1 %v1257_v40 }
 0x158   : > { %3447 = vmatmul.mubr.msk.f32.vlgmr.msra.gmra.mrb[0].mxu1 %vm1265_vm1, %v1262_v41 }
 0x22b   : > { %v3448_v44 = vpop.f32.mrb[0].mxu1 }
 0x22c   : > { %v1338_v46 = vpop.f32.mrb[1].mxu1  ;;  %v1344_v48 = vadd.f32 %v3448_v44, %v1264_v45 }
 0x22d   : > { %v1339_v47 = vadd.f32 %v1338_v46, %v1263_v43 }
 0x22e   : > { %v1353_v50 = vsel %vm1349_vm2, %v1344_v48, 0.0 }
 0x22f   : > { %v1350_v49 = vsel %vm1349_vm2, %v1339_v47, 0.0 }
 0x230   : > { %1351 = vadd.xlane.f32.xlu0 %v1350_v49 }
 0x234   : > { %1354 = vadd.xlane.f32.xlu0 %v1353_v50 }
 0x2bd   : > { %v1352_v51 = vpop.xlane.xlu0 %1351 }
 0x2be   : > { %v1357_v52 = vmul.f32 0.03125, %v1352_v51 }
 0x2c0   : > { %v1359_v53 = vsub.f32 %v1339_v47, %v1357_v52 }
 0x2c1   : > { %v1355_v54 = vpop.xlane.xlu0 %1354 }
 0x2c2   : > { %v1358_v55 = vmul.f32 0.03125, %v1355_v54  ;;  %v1361_v56 = vmul.f32 %v1359_v53, %v1359_v53 }
 0x2c4   : > { %v1360_v57 = vsub.f32 %v1344_v48, %v1358_v55  ;;  %v1363_v58 = vsel %vm1349_vm2, %v1361_v56, 0.0 }
 0x2c5   : > { %1364 = vadd.xlane.f32.xlu1 %v1363_v58 }
 0x2c6   : > { %v1362_v59 = vmul.f32 %v1360_v57, %v1360_v57 }
 0x2c8   : > { %v1366_v60 = vsel %vm1349_vm2, %v1362_v59, 0.0 }
 0x2c9   : > { %1367 = vadd.xlane.f32.xlu1 %v1366_v60 }
 0x352   : > { %v1365_v61 = vpop.xlane.xlu1 %1364 }
 0x353   : > { %v1369_v62 = vmul.f32 0.03125, %v1365_v61 }
 0x355   : > { %v1371_v63 = vadd.f32 1e-05, %v1369_v62 }
 0x356   : > { %v1368_v0 = vpop.xlane.xlu1 %1367 }
 0x357   : > { %3901 = vrsqrt.f32 %v1371_v63  ;;  %v1370_v1 = vmul.f32 0.03125, %v1368_v0 }
 0x359   : > { %v1372_v2 = vadd.f32 1e-05, %v1370_v1 }
 0x35b   : > { %3903 = vrsqrt.f32 %v1372_v2 }
 0x361   : > { %v3902_v3 = vpop.eup %3901 }
 0x362   : > { %v1375_v5 = vmul.f32 %v3902_v3, %v1359_v53 }
 0x364   : > { %v1383_v7 = vmul.f32 %v3224_v4, %v1375_v5 }
 0x365   : > { %v3904_v8 = vpop.eup %3903 }
 0x366   : > { %v1391_v9 = vadd.f32 %v3225_v6, %v1383_v7  ;;  %v1376_v10 = vmul.f32 %v3904_v8, %v1360_v57 }
 0x368   : > { %1393 = vst.msk [vmem:[#allocation2] sm:$0xff] %vm1349_vm2, %v1391_v9  ;;  %v1384_v11 = vmul.f32 %v3224_v4, %v1376_v10 }
 0x36a   : > { %v1392_v12 = vadd.f32 %v3225_v6, %v1384_v11 }
 0x36c   : > { %1394 = vst.msk [vmem:[#allocation2 + $0x8] sm:$0xff] %vm1349_vm2, %v1392_v12 }
 0x36d PF: > { %vm1415_vm3 = vcmask 261120   ;;  %s4609_s9 = sld [smem:[#allocation12_spill]]  ;;  %vm1459_vm4 = vcmask 130048   ;;  %v1853_v28 = vld [vmem:[%s4218_s7] sm:$0xff]  ;;  %v1854_v29 = vld [vmem:[%s4218_s7 + $0x8] sm:$0xff]  ;;  %v1855_v31 = vld [vmem:[%s4218_s7 + $0x10] sm:$0xff] }
 0x36e   : > { %v3731_v30 = vpack.c.bf16 %v1854_v29, %v1853_v28  ;;  %v1856_v32 = vld [vmem:[%s4218_s7 + $0x18] sm:$0xff]  ;;  %s4610_s22 = sld [smem:[#allocation20_spill]]  ;;  %s4611_s5 = sld [smem:[#allocation21_spill]]  ;;  %v1589_v48 = vld [vmem:[%s4210_s28] sm:$0xff]  ;;  %v1590_v49 = vld [vmem:[%s4210_s28 + $0x8] sm:$0xff]  ;;  %vm2138_vm6 = vcmask 523264  }
 0x36f   : > { %v4281_v13 = vld [vmem:[#allocation2] sm:$0xff]  ;;  %v3735_v33 = vpack.c.bf16 %v1856_v32, %v1855_v31  ;;  %v3715_v53 = vpack.c.bf16 %v1590_v49, %v1589_v48  ;;  %v1591_v54 = vld [vmem:[%s4210_s28 + $0x10] sm:$0xff]  ;;  %v1592_v55 = vld [vmem:[%s4210_s28 + $0x18] sm:$0xff]  ;;  %s4618_s28 = sld [smem:[#allocation15_spill]]  ;;  %p3300_p5 = scmp.ne.s32.totalorder %s4194_s16, 1 }
 0x370   : > { %v1416_v15 = vsel %vm1415_vm3, %v4281_v13, 0.0  ;;  %3732 = vmatprep.subr.bf16.mxu1 %v3731_v30  ;;  %v3719_v58 = vpack.c.bf16 %v1592_v55, %v1591_v54  ;;  %v1737_v0 = vld [vmem:[%s4213_s1] sm:$0xff]  ;;  %v1738_v1 = vld [vmem:[%s4213_s1 + $0x8] sm:$0xff]  ;;  %v1739_v3 = vld [vmem:[%s4213_s1 + $0x10] sm:$0xff]  ;;  %vm4025_vm7 = vmmov (!%p3300_p5), 0   ;;  %vm2871_vm8 = vcmask (!%p3300_p5), 254976  }
 0x371   : > { %1417 = vadd.xlane.f32.xlu0 %v1416_v15  ;;  %3734 = vmatpush3.bf16.msra.mxu1 %v3731_v30  ;;  %v3723_v2 = vpack.c.bf16 %v1738_v1, %v1737_v0  ;;  %v1740_v4 = vld [vmem:[%s4213_s1 + $0x18] sm:$0xff]  ;;  %vm4400_vm5 = vmpackc.low %vm1415_vm3, %vm1415_vm3  ;;  %s4619_s1 = sld [smem:[#allocation13_spill]]  ;;  %vm2976_vm9 = vcmask (!%p3300_p5), 123904  }
 0x372   : > { %3736 = vmatprep.subr.bf16.mxu1 %v3735_v33  ;;  %v3727_v7 = vpack.c.bf16 %v1740_v4, %v1739_v3 }
 0x373   : > { %v4283_v14 = vld [vmem:[#allocation2 + $0x8] sm:$0xff]  ;;  %v1397_v27 = vld [vmem:[%s4609_s9] sm:$0xff]  ;;  %v1399_v57 = vld [vmem:[%s4609_s9 + $0x10] sm:$0xff] }
 0x374   : > { %v1419_v16 = vsel %vm1415_vm3, %v4283_v14, 0.0  ;;  %3453 = vmatprep.mubr.msk.f32.mxu0 %vm1459_vm4, %v1397_v27  ;;  %s4612_s7 = scalar_lea.vmem %s4610_s22, %s4200_s0  ;;  %s4613_s15 = scalar_lea.vmem %s4611_s5, %s4200_s0  ;;  %v1398_v56 = vld [vmem:[%s4609_s9 + $0x8] sm:$0xff]  ;;  %v1400_v59 = vld [vmem:[%s4609_s9 + $0x18] sm:$0xff]  ;;  %v1401_v60 = vld [vmem:[%s4609_s9 + $0x20] sm:$0xff] }
 0x375   : > { %1420 = vadd.xlane.f32.xlu0 %v1419_v16  ;;  %3738 = vmatpush3.bf16.msra.mxu1 %v3735_v33  ;;  %v3226_v42 = vld [vmem:[%s4612_s7] ss:$0 sm:$0xff]  ;;  %v1402_v61 = vld [vmem:[%s4609_s9 + $0x28] sm:$0xff]  ;;  %v1403_v62 = vld [vmem:[%s4609_s9 + $0x30] sm:$0xff]  ;;  %s4614_s5 = sld [smem:[#allocation14_spill]]  ;;  %s4625_s22 = sld [smem:[#allocation16_spill]] (!%p3300_p5) }
 0x376   : > { %v3227_v46 = vld [vmem:[%s4613_s15] ss:$0 sm:$0xff]  ;;  %v1404_v63 = vld [vmem:[%s4609_s9 + $0x38] sm:$0xff]  ;;  %s4615_s15 = scalar_lea.vmem %s4121_s4, %s4200_s0  ;;  %s4627_s7 = sld [smem:[#allocation17_spill]] (!%p3300_p5) }
 0x377   : > { %v3254_v16 = vld [vmem:[%s1126_s10] ss:$0 sm:$0xff]  ;;  %s4621_s10 = scalar_lea.vmem %s4156_s8, %s4200_s0 }
 0x37b   : > { %v4368_v30 = vld [vmem:[%s4614_s5 + $0x18] sm:$0xff] }
 0x3fe   : > { %v1418_v17 = vpop.xlane.xlu0 %1417 }
 0x3ff   : > { %v1423_v18 = vmul.f32 0.03125, %v1418_v17  ;;  %v4357_v17 = vld [vmem:[%s4615_s15] ss:$0 sm:$0xff]  ;;  %s4628_s15 = sld [smem:[#allocation18_spill]] (!%p3300_p5) }
 0x401   : > { %v1425_v19 = vsub.f32 %v4281_v13, %v1423_v18  ;;  %v4360_v18 = vld [vmem:[%s4614_s5 + $0x8] sm:$0xff] }
 0x402   : > { %v1421_v20 = vpop.xlane.xlu0 %1420 }
 0x403   : > { %v1424_v21 = vmul.f32 0.03125, %v1421_v20  ;;  %v1427_v22 = vmul.f32 %v1425_v19, %v1425_v19 }
 0x405   : > { %v1426_v23 = vsub.f32 %v4283_v14, %v1424_v21  ;;  %v1429_v24 = vsel %vm1415_vm3, %v1427_v22, 0.0  ;;  %v1405_v22 = vld [vmem:[%s4614_s5] sm:$0xff] }
 0x406   : > { %1430 = vadd.xlane.f32.xlu1 %v1429_v24 }
 0x407   : > { %v1428_v25 = vmul.f32 %v1426_v23, %v1426_v23 }
 0x409   : > { %v1432_v26 = vsel %vm1415_vm3, %v1428_v25, 0.0 }
 0x40a   : > { %1433 = vadd.xlane.f32.xlu1 %v1432_v26 }
 0x493   : > { %v1431_v34 = vpop.xlane.xlu1 %1430 }
 0x494   : > { %v1435_v35 = vmul.f32 0.03125, %v1431_v34  ;;  %v4373_v34 = vld [vmem:[%s4614_s5 + $0x10] sm:$0xff] }
 0x496   : > { %v1437_v36 = vadd.f32 1e-05, %v1435_v35 }
 0x497   : > { %v1434_v37 = vpop.xlane.xlu1 %1433 }
 0x498   : > { %3905 = vrsqrt.f32 %v1437_v36  ;;  %v1436_v38 = vmul.f32 0.03125, %v1434_v37 }
 0x49a   : > { %v1438_v39 = vadd.f32 1e-05, %v1436_v38 }
 0x49c   : > { %3907 = vrsqrt.f32 %v1438_v39 }
 0x4a2   : > { %v3906_v40 = vpop.eup %3905 }
 0x4a3   : > { %v1441_v41 = vmul.f32 %v3906_v40, %v1425_v19 }
 0x4a5   : > { %v1449_v45 = vmul.f32 %v3226_v42, %v1441_v41  ;;  %v4381_v41 = vld [vmem:[%s4614_s5 + $0x28] sm:$0xff] }
 0x4a6   : > { %v3908_v43 = vpop.eup %3907 }
 0x4a7   : > { %v1442_v44 = vmul.f32 %v3908_v43, %v1426_v23  ;;  %v1457_v50 = vadd.f32 %v3227_v46, %v1449_v45  ;;  %v4386_v45 = vld [vmem:[%s4614_s5 + $0x20] sm:$0xff] }
 0x4a9   : > { %v1450_v47 = vmul.f32 %v3226_v42, %v1442_v44 }
 0x4ab   : > { %v1458_v51 = vadd.f32 %v3227_v46, %v1450_v47 }
 0x4ad   : > { %v3711_v52 = vpack.c.bf16 %v1458_v51, %v1457_v50 }
 0x4af   : > { %3712 = vmatprep.subr.bf16.mxu0 %v3711_v52 }
 0x4b0   : > { %3714 = vmatpush3.bf16.msra.mxu0 %v3711_v52  ;;  %v4391_v52 = vld [vmem:[%s4614_s5 + $0x38] sm:$0xff] }
 0x4b1   : > { %3716 = vmatprep.subr.bf16.mxu0 %v3715_v53 }
 0x4b3   : > { %3454 = vmatmul.mubr.msk.f32.vlgmr.msra.gmra.mrb[0].mxu0 %vm1459_vm4, %v1398_v56  ;;  %v1411_v56 = vld [vmem:[%s4614_s5 + $0x30] sm:$0xff] }
 0x4b4   : > { %3456 = vmatprep.mubr.msk.f32.mxu0 %vm1459_vm4, %v1399_v57  ;;  %3718 = vmatpush3.bf16.msra.mxu0 %v3715_v53 }
 0x4b5   : > { %3720 = vmatprep.subr.bf16.mxu0 %v3719_v58 }
 0x4b7   : > { %3457 = vmatmul.mubr.msk.f32.gmra.mrb[2].mxu0 %vm1459_vm4, %v1400_v59 }
 0x4b8   : > { %3459 = vmatprep.mubr.msk.f32.mxu0 %vm1459_vm4, %v1401_v60  ;;  %3722 = vmatpush3.bf16.msra.mxu0 %v3719_v58  ;;  %v3245_v60 = vld [vmem:[%s1118_s2] ss:$0 sm:$0xff]  ;;  %s4620_s2 = scalar_lea.vmem %s4151_s14, %s4200_s0 }
 0x4b9   : > { %3724 = vmatprep.subr.bf16.mxu0 %v3723_v2 }
 0x4bb   : > { %3460 = vmatmul.mubr.msk.f32.gmra.mrb[4].mxu0 %vm1459_vm4, %v1402_v61 }
 0x4bc   : > { %3462 = vmatprep.mubr.msk.f32.mxu0 %vm1459_vm4, %v1403_v62 }
 0x4bf   : > { %3463 = vmatmul.mubr.msk.f32.gmra.mrb[6].mxu0 %vm1459_vm4, %v1404_v63 }
 0x586   : > { %v3455_v5 = vpop.f32.mrb[0].mxu0 }
 0x587   : > { %v1550_v6 = vpop.f32.mrb[1].mxu0 }
 0x588   : > { %3473 = vmatprep.mubr.msk.f32.mxu0 %vm1415_vm3, %v1550_v6  ;;  %3513 = vmatprep.mubr.msk.f32.mxu1 %vm1415_vm3, %v1550_v6 }
 0x589   : > { %3474 = vmatmul.mubr.msk.f32.vlgmr.msra.gmra.mrb[8].mxu0 %vm1415_vm3, %v3455_v5  ;;  %3514 = vmatmul.mubr.msk.f32.vlgmr.msra.gmra.mrb[0].mxu1 %vm1415_vm3, %v3455_v5 }
 0x58a   : > { %v3458_v8 = vpop.f32.mrb[2].mxu0  ;;  %3726 = vmatpush3.bf16.msra.mxu0 %v3723_v2 }
 0x58b   : > { %v1560_v9 = vpop.f32.mrb[3].mxu0  ;;  %3728 = vmatprep.subr.bf16.mxu0 %v3727_v7 }
 0x58c   : > { %3476 = vmatprep.mubr.msk.f32.mxu0 %vm1415_vm3, %v1560_v9  ;;  %3516 = vmatprep.mubr.msk.f32.mxu1 %vm1415_vm3, %v1560_v9 }
 0x58d   : > { %3477 = vmatmul.mubr.msk.f32.gmra.mrb[10].mxu0 %vm1415_vm3, %v3458_v8  ;;  %3517 = vmatmul.mubr.msk.f32.gmra.mrb[2].mxu1 %vm1415_vm3, %v3458_v8 }
 0x58e   : > { %v3461_v10 = vpop.f32.mrb[4].mxu0  ;;  %3730 = vmatpush3.bf16.msra.mxu0 %v3727_v7 }
 0x58f   : > { %v1570_v11 = vpop.f32.mrb[5].mxu0 }
 0x590   : > { %3479 = vmatprep.mubr.msk.f32.mxu0 %vm1415_vm3, %v1570_v11  ;;  %3519 = vmatprep.mubr.msk.f32.mxu1 %vm1415_vm3, %v1570_v11 }
 0x591   : > { %3480 = vmatmul.mubr.msk.f32.gmra.mrb[12].mxu0 %vm1415_vm3, %v3461_v10  ;;  %3520 = vmatmul.mubr.msk.f32.gmra.mrb[4].mxu1 %vm1415_vm3, %v3461_v10 }
 0x592   : > { %v3464_v12 = vpop.f32.mrb[6].mxu0 }
 0x593   : > { %v1580_v15 = vpop.f32.mrb[7].mxu0 }
 0x594   : > { %3482 = vmatprep.mubr.msk.f32.mxu0 %vm1415_vm3, %v1580_v15  ;;  %3522 = vmatprep.mubr.msk.f32.mxu1 %vm1415_vm3, %v1580_v15 }
 0x595   : > { %3483 = vmatmul.mubr.msk.f32.gmra.mrb[14].mxu0 %vm1415_vm3, %v3464_v12  ;;  %3523 = vmatmul.mubr.msk.f32.gmra.mrb[6].mxu1 %vm1415_vm3, %v3464_v12 }
 0x596   : > { %3493 = vmatprep.mubr.msk.f32.mxu0 %vm1415_vm3, %v1550_v6 }
 0x599   : > { %3494 = vmatmul.mubr.msk.f32.vlgmr.msra.gmra.mrb[16].mxu0 %vm1415_vm3, %v3455_v5 }
 0x59a   : > { %3496 = vmatprep.mubr.msk.f32.mxu0 %vm1415_vm3, %v1560_v9 }
 0x59d   : > { %3497 = vmatmul.mubr.msk.f32.gmra.mrb[18].mxu0 %vm1415_vm3, %v3458_v8 }
 0x59e   : > { %3499 = vmatprep.mubr.msk.f32.mxu0 %vm1415_vm3, %v1570_v11 }
 0x5a1   : > { %3500 = vmatmul.mubr.msk.f32.gmra.mrb[20].mxu0 %vm1415_vm3, %v3461_v10 }
 0x5a2   : > { %3502 = vmatprep.mubr.msk.f32.mxu0 %vm1415_vm3, %v1580_v15 }
 0x5a5   : > { %3503 = vmatmul.mubr.msk.f32.gmra.mrb[22].mxu0 %vm1415_vm3, %v3464_v12 }
 0x65c   : > { %v4362_v19 = vpop.f32.mrb[8].mxu0  ;;  %v3515_v20 = vpop.f32.mrb[0].mxu1 }
 0x65d   : > { %v1936_v21 = vadd.f32 %v3515_v20, %v3254_v16  ;;  %v1690_v23 = vpop.f32.mrb[9].mxu0  ;;  %v1930_v24 = vpop.f32.mrb[1].mxu1 }
 0x65e   : > { %v1691_v25 = vadd.f32 %v4357_v17, %v1690_v23  ;;  %v1931_v26 = vadd.f32 %v3254_v16, %v1930_v24 }
 0x65f   : > { %v1970_v27 = vmul.f32 %v1936_v21, %v4360_v18 }
 0x660   : > { %v1729_v28 = vmul.f32 %v1691_v25, %v1405_v22  ;;  %v1969_v29 = vmul.f32 %v1931_v26, %v1405_v22  ;;  %v4370_v31 = vpop.f32.mrb[10].mxu0  ;;  %v3518_v32 = vpop.f32.mrb[2].mxu1 }
 0x661   : > { %v1946_v33 = vadd.f32 %v3518_v32, %v3254_v16  ;;  %v4375_v35 = vpop.f32.mrb[11].mxu0  ;;  %v1940_v36 = vpop.f32.mrb[3].mxu1  ;;  %v1706_v32 = vadd.f32 %v4370_v31, %v4357_v17 }
 0x662   : > { %v1941_v37 = vadd.f32 %v3254_v16, %v1940_v36  ;;  %3541 = vmatprep.mubr.msk.f32.mxu0 %vm1415_vm3, %v1729_v28  ;;  %v3763_v38 = vpack.c.bf16 %v1970_v27, %v1969_v29  ;;  %v1696_v27 = vadd.f32 %v4362_v19, %v4357_v17  ;;  %v1701_v28 = vadd.f32 %v4357_v17, %v4375_v35 }
 0x663   : > { %v1972_v39 = vmul.f32 %v1946_v33, %v4368_v30  ;;  %v1732_v19 = vmul.f32 %v1706_v32, %v4368_v30 }
 0x664   : > { %v1971_v40 = vmul.f32 %v1941_v37, %v4373_v34  ;;  %v4383_v42 = vpop.f32.mrb[12].mxu0  ;;  %v3521_v43 = vpop.f32.mrb[4].mxu1  ;;  %3764 = vmatprep.subr.bf16.mxu1 %v3763_v38  ;;  %v1730_v29 = vmul.f32 %v1696_v27, %v4360_v18  ;;  %v1731_v33 = vmul.f32 %v1701_v28, %v4373_v34 }
 0x665   : > { %v1956_v44 = vadd.f32 %v3521_v43, %v3254_v16  ;;  %v1710_v46 = vpop.f32.mrb[13].mxu0  ;;  %v1950_v47 = vpop.f32.mrb[5].mxu1  ;;  %3766 = vmatpush3.bf16.msra.mxu1 %v3763_v38  ;;  %v1716_v35 = vadd.f32 %v4383_v42, %v4357_v17 }
 0x666   : > { %v1951_v48 = vadd.f32 %v3254_v16, %v1950_v47  ;;  %v3767_v49 = vpack.c.bf16 %v1972_v39, %v1971_v40  ;;  %v1711_v36 = vadd.f32 %v4357_v17, %v1710_v46  ;;  %v1978_v39 = vld [vmem:[%s4618_s28 + $0x8] sm:$0xff]  ;;  %v1977_v40 = vld [vmem:[%s4618_s28] sm:$0xff]  ;;  %v1979_v46 = vld [vmem:[%s4618_s28 + $0x10] sm:$0xff] }
 0x667   : > { %v1974_v50 = vmul.f32 %v1956_v44, %v4381_v41  ;;  %v1734_v31 = vmul.f32 %v1716_v35, %v4381_v41 }
 0x668   : > { %v1973_v51 = vmul.f32 %v1951_v48, %v4386_v45  ;;  %v3484_v53 = vpop.f32.mrb[14].mxu0  ;;  %v3524_v54 = vpop.f32.mrb[6].mxu1  ;;  %3768 = vmatprep.subr.bf16.mxu1 %v3767_v49  ;;  %v1733_v18 = vmul.f32 %v1711_v36, %v4386_v45  ;;  %v1980_v45 = vld [vmem:[%s4618_s28 + $0x18] sm:$0xff] }
 0x669   : > { %v1966_v55 = vadd.f32 %v3524_v54, %v3254_v16  ;;  %v1720_v57 = vpop.f32.mrb[15].mxu0  ;;  %v1960_v58 = vpop.f32.mrb[7].mxu1  ;;  %3770 = vmatpush3.bf16.msra.mxu1 %v3767_v49  ;;  %v1726_v34 = vadd.f32 %v3484_v53, %v4357_v17  ;;  %v1981_v54 = vld [vmem:[%s4618_s28 + $0x20] sm:$0xff] }
 0x66a   : > { %v1961_v59 = vadd.f32 %v3254_v16, %v1960_v58  ;;  %v3771_v61 = vpack.c.bf16 %v1974_v50, %v1973_v51  ;;  %v1721_v37 = vadd.f32 %v4357_v17, %v1720_v57 }
 0x66b   : > { %v1976_v62 = vmul.f32 %v1966_v55, %v4391_v52  ;;  %v1736_v30 = vmul.f32 %v1726_v34, %v4391_v52  ;;  %v1982_v52 = vld [vmem:[%s4618_s28 + $0x28] sm:$0xff] }
 0x66c   : > { %v1975_v63 = vmul.f32 %v1961_v59, %v1411_v56  ;;  %v3495_v0 = vpop.f32.mrb[16].mxu0  ;;  %3772 = vmatprep.subr.bf16.mxu1 %v3771_v61  ;;  %v1735_v38 = vmul.f32 %v1721_v37, %v1411_v56 }
 0x66d   : > { %v1820_v1 = vadd.f32 %v3495_v0, %v3245_v60  ;;  %v1814_v2 = vpop.f32.mrb[17].mxu0  ;;  %3774 = vmatpush3.bf16.msra.mxu1 %v3771_v61 }
 0x66e   : > { %v1815_v3 = vadd.f32 %v3245_v60, %v1814_v2  ;;  %v3775_v4 = vpack.c.bf16 %v1976_v62, %v1975_v63  ;;  %v1983_v62 = vld [vmem:[%s4618_s28 + $0x30] sm:$0xff] }
 0x670   : > { %v3739_v6 = vpack.c.bf16 %v1820_v1, %v1815_v3  ;;  %v3498_v7 = vpop.f32.mrb[18].mxu0  ;;  %3776 = vmatprep.subr.bf16.mxu1 %v3775_v4 }
 0x671   : > { %v1830_v8 = vadd.f32 %v3498_v7, %v3245_v60  ;;  %v1824_v9 = vpop.f32.mrb[19].mxu0  ;;  %3778 = vmatpush3.bf16.msra.mxu1 %v3775_v4 }
 0x672   : > { %v1825_v10 = vadd.f32 %v3245_v60, %v1824_v9  ;;  %3741 = vmatprep.subr.msk.bf16.mxu0 %vm4400_vm5, %v3739_v6 }
 0x673   : > { %3744 = vmatpush3.bf16.xpose.msk.msra.mxu0 %vm4400_vm5, %v3739_v6 }
 0x674   : > { %v3745_v11 = vpack.c.bf16 %v1830_v8, %v1825_v10  ;;  %v3501_v12 = vpop.f32.mrb[20].mxu0 }
 0x675   : > { %v1840_v15 = vadd.f32 %v3501_v12, %v3245_v60  ;;  %v1834_v16 = vpop.f32.mrb[21].mxu0 }
 0x676   : > { %v1835_v20 = vadd.f32 %v3245_v60, %v1834_v16  ;;  %3747 = vmatprep.subr.msk.bf16.mxu0 %vm4400_vm5, %v3745_v11 }
 0x678   : > { %v3751_v21 = vpack.c.bf16 %v1840_v15, %v1835_v20  ;;  %v3504_v22 = vpop.f32.mrb[22].mxu0 }
 0x679   : > { %v1850_v23 = vadd.f32 %v3504_v22, %v3245_v60  ;;  %v1844_v24 = vpop.f32.mrb[23].mxu0 }
 0x67a   : > { %v1845_v25 = vadd.f32 %v3245_v60, %v1844_v24  ;;  %v1984_v60 = vld [vmem:[%s4618_s28 + $0x38] sm:$0xff] }
 0x67b   : > { %3750 = vmatpush3.bf16.xpose.msk.msra.mxu0 %vm4400_vm5, %v3745_v11 }
 0x67c   : > { %v3757_v26 = vpack.c.bf16 %v1850_v23, %v1845_v25  ;;  %3753 = vmatprep.subr.msk.bf16.mxu0 %vm4400_vm5, %v3751_v21 }
 0x683   : > { %3756 = vmatpush3.bf16.xpose.msk.msra.mxu0 %vm4400_vm5, %v3751_v21 }
 0x684   : > { %3759 = vmatprep.subr.msk.bf16.mxu0 %vm4400_vm5, %v3757_v26 }
 0x68b   : > { %3762 = vmatpush3.bf16.xpose.msk.msra.mxu0 %vm4400_vm5, %v3757_v26 }
 0x692   : > { %3542 = vmatmul.mubr.msk.f32.vlgmr.msra.gmra.mrb[24].mxu0 %vm1415_vm3, %v1730_v29 }
 0x693   : > { %3544 = vmatprep.mubr.msk.f32.mxu0 %vm1415_vm3, %v1731_v33 }
 0x696   : > { %3545 = vmatmul.mubr.msk.f32.gmra.mrb[26].mxu0 %vm1415_vm3, %v1732_v19 }
 0x697   : > { %3547 = vmatprep.mubr.msk.f32.mxu0 %vm1415_vm3, %v1733_v18 }
 0x69a   : > { %3548 = vmatmul.mubr.msk.f32.gmra.mrb[28].mxu0 %vm1415_vm3, %v1734_v31 }
 0x69b   : > { %3550 = vmatprep.mubr.msk.f32.mxu0 %vm1415_vm3, %v1735_v38 }
 0x69e   : > { %3551 = vmatmul.mubr.msk.f32.gmra.mrb[30].mxu0 %vm1415_vm3, %v1736_v30 }
 0x765   : > { %v3543_v42 = vpop.f32.mrb[24].mxu0 }
 0x766   : > { %v2105_v43 = vadd.f32 %v3543_v42, %v1978_v39  ;;  %v2099_v41 = vpop.f32.mrb[25].mxu0 }
 0x767   : > { %v2100_v44 = vadd.f32 %v2099_v41, %v1977_v40 }
 0x768   : > { %v2142_v17 = vsel %vm2138_vm6, %v2105_v43, -inf }
 0x769   : > { %2143 = vmax.xlane.f32.xlu1 %v2142_v17  ;;  %v3546_v47 = vpop.f32.mrb[26].mxu0  ;;  %v2139_v48 = vsel %vm2138_vm6, %v2100_v44, -inf }
 0x76a   : > { %v2115_v49 = vadd.f32 %v3546_v47, %v1980_v45  ;;  %v2109_v50 = vpop.f32.mrb[27].mxu0  ;;  %2140 = vmax.xlane.f32.xlu0 %v2139_v48 }
 0x76b   : > { %v2110_v51 = vadd.f32 %v2109_v50, %v1979_v46 }
 0x76c   : > { %v2148_v53 = vsel %vm2138_vm6, %v2115_v49, -inf }
 0x76d   : > { %2149 = vmax.xlane.f32.xlu1 %v2148_v53  ;;  %v3549_v55 = vpop.f32.mrb[28].mxu0  ;;  %v2145_v56 = vsel %vm2138_vm6, %v2110_v51, -inf }
 0x76e   : > { %v2125_v57 = vadd.f32 %v3549_v55, %v1982_v52  ;;  %v2119_v58 = vpop.f32.mrb[29].mxu0  ;;  %2146 = vmax.xlane.f32.xlu0 %v2145_v56 }
 0x76f   : > { %v2120_v59 = vadd.f32 %v2119_v58, %v1981_v54 }
 0x770   : > { %v2154_v61 = vsel %vm2138_vm6, %v2125_v57, -inf }
 0x771   : > { %2155 = vmax.xlane.f32.xlu1 %v2154_v61  ;;  %v3552_v63 = vpop.f32.mrb[30].mxu0  ;;  %v2151_v0 = vsel %vm2138_vm6, %v2120_v59, -inf }
 0x772   : > { %v2135_v1 = vadd.f32 %v3552_v63, %v1984_v60  ;;  %v2129_v2 = vpop.f32.mrb[31].mxu0  ;;  %2152 = vmax.xlane.f32.xlu0 %v2151_v0 }
 0x773   : > { %v2130_v3 = vadd.f32 %v2129_v2, %v1983_v62 }
 0x774   : > { %v2160_v4 = vsel %vm2138_vm6, %v2135_v1, -inf }
 0x775   : > { %2161 = vmax.xlane.f32.xlu1 %v2160_v4  ;;  %v2157_v5 = vsel %vm2138_vm6, %v2130_v3, -inf }
 0x776   : > { %2158 = vmax.xlane.f32.xlu0 %v2157_v5 }
 0x7f6   : > { %v2144_v6 = vpop.xlane.xlu1 %2143 }
 0x7f7   : > { %v2164_v7 = vsub.f32 %v2105_v43, %v2144_v6  ;;  %v2141_v8 = vpop.xlane.xlu0 %2140 }
 0x7f8   : > { %v2163_v9 = vsub.f32 %v2100_v44, %v2141_v8  ;;  %v2356_v8 = vld [vmem:[%s4619_s1] sm:$0xff] }
 0x7f9   : > { %v2173_v10 = vmul.f32 1.442695, %v2164_v7 }
 0x7fa   : > { %v2171_v11 = vmul.f32 1.442695, %v2163_v9  ;;  %v2150_v12 = vpop.xlane.xlu1 %2149 }
 0x7fb   : > { %3909 = vpow2.f32 %v2173_v10  ;;  %v2166_v15 = vsub.f32 %v2115_v49, %v2150_v12  ;;  %v2147_v16 = vpop.xlane.xlu0 %2146 }
 0x7fc   : > { %3911 = vpow2.f32 %v2171_v11  ;;  %v2165_v20 = vsub.f32 %v2110_v51, %v2147_v16 }
 0x7fd   : > { %v2177_v21 = vmul.f32 1.442695, %v2166_v15 }
 0x7fe   : > { %v2175_v22 = vmul.f32 1.442695, %v2165_v20  ;;  %v2156_v23 = vpop.xlane.xlu1 %2155 }
 0x7ff   : > { %3913 = vpow2.f32 %v2177_v21  ;;  %v2168_v24 = vsub.f32 %v2125_v57, %v2156_v23  ;;  %v2153_v25 = vpop.xlane.xlu0 %2152  ;;  %v2439_v23 = vld [vmem:[%s4223_s11] sm:$0xff] }
 0x800   : > { %3915 = vpow2.f32 %v2175_v22  ;;  %v2167_v26 = vsub.f32 %v2120_v59, %v2153_v25 }
 0x801   : > { %v2181_v27 = vmul.f32 1.442695, %v2168_v24  ;;  %v2440_v24 = vld [vmem:[%s4223_s11 + $0x8] sm:$0xff] }
 0x802   : > { %v2179_v28 = vmul.f32 1.442695, %v2167_v26  ;;  %v2162_v29 = vpop.xlane.xlu1 %2161 }
 0x803   : > { %3917 = vpow2.f32 %v2181_v27  ;;  %v2170_v32 = vsub.f32 %v2135_v1, %v2162_v29  ;;  %v2159_v33 = vpop.xlane.xlu0 %2158  ;;  %v2441_v29 = vld [vmem:[%s4223_s11 + $0x10] sm:$0xff] }
 0x804   : > { %3919 = vpow2.f32 %v2179_v28  ;;  %v2169_v36 = vsub.f32 %v2130_v3, %v2159_v33  ;;  %v3795_v28 = vpack.c.bf16 %v2440_v24, %v2439_v23  ;;  %v2357_v33 = vld [vmem:[%s4619_s1 + $0x8] sm:$0xff]  ;;  %v2695_v24 = vld [vmem:[%s4238_s12 + $0x40] sm:$0xff] }
 0x805   : > { %v3910_v19 = vpop.eup %3909  ;;  %v2185_v35 = vmul.f32 1.442695, %v2170_v32  ;;  %v2442_v32 = vld [vmem:[%s4223_s11 + $0x18] sm:$0xff]  ;;  %s4623_s11 = scalar_lea.vmem %s4171_s21, %s4200_s0 }
 0x806   : > { %v3912_v18 = vpop.eup %3911  ;;  %v2183_v37 = vmul.f32 1.442695, %v2169_v36  ;;  %v2190_v31 = vsel %vm2138_vm6, %v3910_v19, 0.0  ;;  %v3799_v36 = vpack.c.bf16 %v2442_v32, %v2441_v29  ;;  %v2699_v32 = vld [vmem:[%s4238_s12 + $0x60] sm:$0xff] }
 0x807   : > { %3921 = vpow2.f32 %v2185_v35  ;;  %2191 = vadd.xlane.f32.xlu1 %v2190_v31  ;;  %v2187_v34 = vsel %vm2138_vm6, %v3912_v18, 0.0 }
 0x808   : > { %3923 = vpow2.f32 %v2183_v37  ;;  %2188 = vadd.xlane.f32.xlu0 %v2187_v34  ;;  %v3291_v37 = vld [vmem:[%s4620_s2] ss:$0 sm:$0xff] }
 0x809   : > { %v3914_v38 = vpop.eup %3913 }
 0x80a   : > { %v3916_v30 = vpop.eup %3915  ;;  %v2196_v39 = vsel %vm2138_vm6, %v3914_v38, 0.0 }
 0x80b   : > { %2197 = vadd.xlane.f32.xlu1 %v2196_v39  ;;  %v2193_v40 = vsel %vm2138_vm6, %v3916_v30, 0.0 }
 0x80c   : > { %2194 = vadd.xlane.f32.xlu0 %v2193_v40 }
 0x80d   : > { %v3918_v42 = vpop.eup %3917 }
 0x80e   : > { %v3920_v43 = vpop.eup %3919  ;;  %v2202_v41 = vsel %vm2138_vm6, %v3918_v42, 0.0 }
 0x80f   : > { %2203 = vadd.xlane.f32.xlu1 %v2202_v41  ;;  %v2199_v44 = vsel %vm2138_vm6, %v3920_v43, 0.0 }
 0x810   : > { %2200 = vadd.xlane.f32.xlu0 %v2199_v44 }
 0x811   : > { %v3922_v45 = vpop.eup %3921 }
 0x812   : > { %v3924_v17 = vpop.eup %3923  ;;  %v2208_v46 = vsel %vm2138_vm6, %v3922_v45, 0.0 }
 0x813   : > { %2209 = vadd.xlane.f32.xlu1 %v2208_v46  ;;  %v2205_v47 = vsel %vm2138_vm6, %v3924_v17, 0.0 }
 0x814   : > { %2206 = vadd.xlane.f32.xlu0 %v2205_v47 }
 0x894   : > { %v2192_v48 = vpop.xlane.xlu1 %2191 }
 0x895   : > { %3925 = vrcp.f32 %v2192_v48  ;;  %v2189_v49 = vpop.xlane.xlu0 %2188 }
 0x896   : > { %3927 = vrcp.f32 %v2189_v49  ;;  %v2579_v49 = vld [vmem:[%s4232_s18] sm:$0xff] }
 0x898   : > { %v2198_v50 = vpop.xlane.xlu1 %2197 }
 0x899   : > { %3929 = vrcp.f32 %v2198_v50  ;;  %v2195_v51 = vpop.xlane.xlu0 %2194  ;;  %v2580_v50 = vld [vmem:[%s4232_s18 + $0x8] sm:$0xff] }
 0x89a   : > { %3931 = vrcp.f32 %v2195_v51  ;;  %v3803_v51 = vpack.c.bf16 %v2580_v50, %v2579_v49 }
 0x89c   : > { %v2204_v52 = vpop.xlane.xlu1 %2203  ;;  %3804 = vmatprep.subr.bf16.mxu0 %v3803_v51 }
 0x89d   : > { %3933 = vrcp.f32 %v2204_v52  ;;  %v2201_v53 = vpop.xlane.xlu0 %2200  ;;  %v2581_v52 = vld [vmem:[%s4232_s18 + $0x10] sm:$0xff]  ;;  %3806 = vmatpush3.bf16.msra.mxu0 %v3803_v51 }
 0x89e   : > { %3935 = vrcp.f32 %v2201_v53  ;;  %v2582_v53 = vld [vmem:[%s4232_s18 + $0x18] sm:$0xff]  ;;  %s4622_s18 = scalar_lea.vmem %s4161_s29, %s4200_s0 }
 0x89f   : > { %v3926_v54 = vpop.eup %3925 }
 0x8a0   : > { %v3928_v55 = vpop.eup %3927  ;;  %v2210_v56 = vpop.xlane.xlu1 %2209  ;;  %v2220_v59 = vmul.f32 %v3926_v54, %v3910_v19  ;;  %v3807_v54 = vpack.c.bf16 %v2582_v53, %v2581_v52 }
 0x8a1   : > { %3937 = vrcp.f32 %v2210_v56  ;;  %v2207_v57 = vpop.xlane.xlu0 %2206  ;;  %v2219_v58 = vmul.f32 %v3928_v55, %v3912_v18 }
 0x8a2   : > { %3939 = vrcp.f32 %v2207_v57  ;;  %3808 = vmatprep.subr.bf16.mxu0 %v3807_v54 }
 0x8a3   : > { %v3930_v60 = vpop.eup %3929  ;;  %3569 = vmatprep.mubr.msk.f32.mxu1 %vm2138_vm6, %v2219_v58  ;;  %3810 = vmatpush3.bf16.msra.mxu0 %v3807_v54 }
 0x8a4   : > { %v3932_v61 = vpop.eup %3931  ;;  %3570 = vmatmul.mubr.msk.f32.vlgmr.msra.gmra.mrb[8].mxu1 %vm2138_vm6, %v2220_v59  ;;  %v2222_v63 = vmul.f32 %v3930_v60, %v3914_v38 }
 0x8a5   : > { %v2221_v62 = vmul.f32 %v3932_v61, %v3916_v30 }
 0x8a7   : > { %v3934_v0 = vpop.eup %3933  ;;  %3572 = vmatprep.mubr.msk.f32.mxu1 %vm2138_vm6, %v2221_v62  ;;  %v3292_v62 = vld [vmem:[%s4621_s10] ss:$0 sm:$0xff] }
 0x8a8   : > { %v3936_v1 = vpop.eup %3935  ;;  %3573 = vmatmul.mubr.msk.f32.gmra.mrb[10].mxu1 %vm2138_vm6, %v2222_v63  ;;  %v2224_v3 = vmul.f32 %v3934_v0, %v3918_v42 }
 0x8a9   : > { %v2223_v2 = vmul.f32 %v3936_v1, %v3920_v43 }
 0x8ab   : > { %v3938_v4 = vpop.eup %3937  ;;  %3575 = vmatprep.mubr.msk.f32.mxu1 %vm2138_vm6, %v2223_v2  ;;  %v3293_v2 = vld [vmem:[%s4622_s18] ss:$0 sm:$0xff] }
 0x8ac   : > { %v3940_v5 = vpop.eup %3939  ;;  %3576 = vmatmul.mubr.msk.f32.gmra.mrb[12].mxu1 %vm2138_vm6, %v2224_v3  ;;  %v2226_v7 = vmul.f32 %v3938_v4, %v3922_v45 }
 0x8ad   : > { %v2225_v6 = vmul.f32 %v3940_v5, %v3924_v17 }
 0x8af   : > { %3578 = vmatprep.mubr.msk.f32.mxu1 %vm2138_vm6, %v2225_v6 }
 0x8b0   : > { %3579 = vmatmul.mubr.msk.f32.gmra.mrb[14].mxu1 %vm2138_vm6, %v2226_v7  ;;  %v2687_v7 = vld [vmem:[%s4238_s12] sm:$0xff] }
 0x8b1   : > { %3597 = vmatprep.mubr.msk.f32.mxu1 %vm2138_vm6, %v2356_v8  ;;  %v2688_v8 = vld [vmem:[%s4238_s12 + $0x8] sm:$0xff] }
 0x977   : > { %v3571_v9 = vpop.f32.mrb[8].mxu1 }
 0x978   : > { %v2317_v10 = vpop.f32.mrb[9].mxu1 }
 0x979   : > { %v3779_v11 = vpack.c.bf16 %v3571_v9, %v2317_v10  ;;  %v3811_v9 = vpack.c.bf16 %v2688_v8, %v2687_v7  ;;  %v2689_v10 = vld [vmem:[%s4238_s12 + $0x10] sm:$0xff] }
 0x97b   : > { %v3574_v12 = vpop.f32.mrb[10].mxu1  ;;  %3780 = vmatprep.subr.bf16.mxu1 %v3779_v11 }
 0x97c   : > { %v2327_v15 = vpop.f32.mrb[11].mxu1  ;;  %3782 = vmatpush3.bf16.msra.mxu1 %v3779_v11  ;;  %v2690_v11 = vld [vmem:[%s4238_s12 + $0x18] sm:$0xff] }
 0x97d   : > { %v3783_v16 = vpack.c.bf16 %v3574_v12, %v2327_v15  ;;  %v3815_v12 = vpack.c.bf16 %v2690_v11, %v2689_v10  ;;  %v2691_v15 = vld [vmem:[%s4238_s12 + $0x20] sm:$0xff] }
 0x97f   : > { %v3577_v20 = vpop.f32.mrb[12].mxu1  ;;  %3784 = vmatprep.subr.bf16.mxu1 %v3783_v16 }
 0x980   : > { %v2337_v21 = vpop.f32.mrb[13].mxu1  ;;  %3786 = vmatpush3.bf16.msra.mxu1 %v3783_v16  ;;  %v2692_v16 = vld [vmem:[%s4238_s12 + $0x28] sm:$0xff] }
 0x981   : > { %v3787_v22 = vpack.c.bf16 %v3577_v20, %v2337_v21  ;;  %v3819_v20 = vpack.c.bf16 %v2692_v16, %v2691_v15  ;;  %v2693_v21 = vld [vmem:[%s4238_s12 + $0x30] sm:$0xff]  ;;  %v3302_v15 = vld [vmem:[%s4627_s7] ss:$0 sm:$0xff] (!%p3300_p5) }
 0x983   : > { %v3580_v25 = vpop.f32.mrb[14].mxu1  ;;  %3788 = vmatprep.subr.bf16.mxu1 %v3787_v22 }
 0x984   : > { %v2347_v26 = vpop.f32.mrb[15].mxu1  ;;  %3790 = vmatpush3.bf16.msra.mxu1 %v3787_v22  ;;  %v2694_v22 = vld [vmem:[%s4238_s12 + $0x38] sm:$0xff] }
 0x985   : > { %v3791_v27 = vpack.c.bf16 %v3580_v25, %v2347_v26  ;;  %v3823_v23 = vpack.c.bf16 %v2694_v22, %v2693_v21  ;;  %v2696_v25 = vld [vmem:[%s4238_s12 + $0x48] sm:$0xff] }
 0x986   : > { %v3827_v26 = vpack.c.bf16 %v2696_v25, %v2695_v24 }
 0x987   : > { %3792 = vmatprep.subr.bf16.mxu1 %v3791_v27 }
 0x988   : > { %3794 = vmatpush3.bf16.msra.mxu1 %v3791_v27  ;;  %v2697_v27 = vld [vmem:[%s4238_s12 + $0x50] sm:$0xff] }
 0x989   : > { %3796 = vmatprep.subr.bf16.mxu1 %v3795_v28 }
 0x98b   : > { %3598 = vmatmul.mubr.msk.f32.vlgmr.msra.gmra.mrb[16].mxu1 %vm2138_vm6, %v2357_v33  ;;  %v2700_v33 = vld [vmem:[%s4238_s12 + $0x68] sm:$0xff] }
 0x98c   : > { %3798 = vmatpush3.bf16.msra.mxu1 %v3795_v28  ;;  %v2698_v28 = vld [vmem:[%s4238_s12 + $0x58] sm:$0xff] }
 0x98d   : > { %3800 = vmatprep.subr.bf16.mxu1 %v3799_v36  ;;  %v3831_v29 = vpack.c.bf16 %v2698_v28, %v2697_v27 }
 0x990   : > { %3802 = vmatpush3.bf16.msra.mxu1 %v3799_v36  ;;  %v3835_v36 = vpack.c.bf16 %v2700_v33, %v2699_v32 }
 0x991   : > { %3812 = vmatprep.subr.bf16.mxu1 %v3811_v9 }
 0xa5e   : > { %v3599_v19 = vpop.f32.mrb[16].mxu1 }
 0xa5f   : > { %v2430_v35 = vpop.f32.mrb[17].mxu1 }
 0xa60   : > { %3608 = vmatprep.mubr.msk.f32.mxu1 %vm1415_vm3, %v2430_v35  ;;  %v2702_v35 = vld [vmem:[%s4238_s12 + $0x78] sm:$0xff] }
 0xa61   : > { %3609 = vmatmul.mubr.msk.f32.vlgmr.msra.gmra.mrb[18].mxu1 %vm1415_vm3, %v3599_v19  ;;  %v2701_v19 = vld [vmem:[%s4238_s12 + $0x70] sm:$0xff]  ;;  %s4624_s12 = scalar_lea.vmem %s4181_s13, %s4200_s0  ;;  %s4626_s0 = sld [smem:[#allocation19_spill]] (!%p3300_p5) }
 0xa62   : > { %3814 = vmatpush3.bf16.msra.mxu1 %v3811_v9  ;;  %v3299_v51 = vld [vmem:[%s4624_s12] ss:$0 sm:$0xff] }
 0xa63   : > { %3816 = vmatprep.subr.bf16.mxu1 %v3815_v12 }
 0xa66   : > { %3818 = vmatpush3.bf16.msra.mxu1 %v3815_v12 }
 0xa67   : > { %3820 = vmatprep.subr.bf16.mxu1 %v3819_v20  ;;  %v2902_v7 = vld [vmem:[%s4626_s0 + $0x18] sm:$0xff] (!%p3300_p5) }
 0xa6a   : > { %3822 = vmatpush3.bf16.msra.mxu1 %v3819_v20  ;;  %v3303_v20 = vld [vmem:[%s4628_s15] ss:$0 sm:$0xff] (!%p3300_p5) }
 0xa6b   : > { %3824 = vmatprep.subr.bf16.mxu1 %v3823_v23 }
 0xa6e   : > { %3826 = vmatpush3.bf16.msra.mxu1 %v3823_v23 }
 0xa6f   : > { %3828 = vmatprep.subr.bf16.mxu1 %v3827_v26 }
 0xa72   : > { %3830 = vmatpush3.bf16.msra.mxu1 %v3827_v26 }
 0xa73   : > { %3832 = vmatprep.subr.bf16.mxu1 %v3831_v29 }
 0xa76   : > { %3834 = vmatpush3.bf16.msra.mxu1 %v3831_v29 }
 0xa77   : > { %3836 = vmatprep.subr.bf16.mxu1 %v3835_v36 }
 0xa7a   : > { %3838 = vmatpush3.bf16.msra.mxu1 %v3835_v36 }
 0xb34   : > { %v3610_v18 = vpop.f32.mrb[18].mxu1 }
 0xb35   : > { %v2525_v31 = vadd.f32 %v3610_v18, %v4283_v14  ;;  %v2515_v34 = vpop.f32.mrb[19].mxu1  ;;  %v3839_v18 = vpack.c.bf16 %v2702_v35, %v2701_v19 }
 0xb36   : > { %v2524_v38 = vadd.f32 %v2515_v34, %v4281_v13 }
 0xb37   : > { %v4491_v30 = vadd.f32 %v3291_v37, %v2525_v31  ;;  %3840 = vmatprep.subr.bf16.mxu1 %v3839_v18 }
 0xb38   : > { %v4493_v39 = vadd.f32 %v3291_v37, %v2524_v38  ;;  %3842 = vmatpush3.bf16.msra.mxu1 %v3839_v18  ;;  %v3294_v37 = vld [vmem:[%s4623_s11] ss:$0 sm:$0xff] }
 0xb39   : > { %v2540_v40 = vsel %vm1415_vm3, %v4491_v30, 0.0 }
 0xb3a   : > { %2541 = vadd.xlane.f32.xlu1 %v2540_v40  ;;  %v2537_v42 = vsel %vm1415_vm3, %v4493_v39, 0.0 }
 0xb3b   : > { %2538 = vadd.xlane.f32.xlu0 %v2537_v42 }
 0xbc7   : > { %v2542_v43 = vpop.xlane.xlu1 %2541 }
 0xbc8   : > { %v2544_v14 = vmul.f32 0.03125, %v2542_v43  ;;  %v2539_v41 = vpop.xlane.xlu0 %2538 }
 0xbc9   : > { %v2543_v13 = vmul.f32 0.03125, %v2539_v41 }
 0xbca   : > { %v2546_v44 = vsub.f32 %v4491_v30, %v2544_v14 }
 0xbcb   : > { %v2545_v45 = vsub.f32 %v4493_v39, %v2543_v13 }
 0xbcc   : > { %v2548_v17 = vmul.f32 %v2546_v44, %v2546_v44 }
 0xbcd   : > { %v2547_v46 = vmul.f32 %v2545_v45, %v2545_v45 }
 0xbce   : > { %v2552_v47 = vsel %vm1415_vm3, %v2548_v17, 0.0 }
 0xbcf   : > { %2553 = vadd.xlane.f32.xlu1 %v2552_v47  ;;  %v2549_v48 = vsel %vm1415_vm3, %v2547_v46, 0.0 }
 0xbd0   : > { %2550 = vadd.xlane.f32.xlu0 %v2549_v48 }
 0xc5c   : > { %v2554_v55 = vpop.xlane.xlu1 %2553 }
 0xc5d   : > { %v2556_v56 = vmul.f32 0.03125, %v2554_v55  ;;  %v2551_v57 = vpop.xlane.xlu0 %2550 }
 0xc5e   : > { %v2555_v58 = vmul.f32 0.03125, %v2551_v57 }
 0xc5f   : > { %v2558_v59 = vadd.f32 1e-05, %v2556_v56 }
 0xc60   : > { %v2557_v60 = vadd.f32 1e-05, %v2555_v58  ;;  %v4024_v58 = vmov (!%p3300_p5), 0.0|0.0  }
 0xc61   : > { %3941 = vrsqrt.f32 %v2558_v59  ;;  %3843 = vmatprep.subr.bf16.mxu0 (!%p3300_p5), %v4024_v58  ;;  %v4026_v59 = vmov (!%p3300_p5), 0.0   ;;  %3846 = vmatprep.subr.bf16.mxu1 (!%p3300_p5), %v4024_v58 }
 0xc62   : > { %3943 = vrsqrt.f32 %v2557_v60 }
 0xc6b   : > { %v3942_v61 = vpop.eup %3941 }
 0xc6c   : > { %v3944_v63 = vpop.eup %3943  ;;  %v2562_v0 = vmul.f32 %v3942_v61, %v2546_v44 }
 0xc6d   : > { %v2561_v1 = vmul.f32 %v3944_v63, %v2545_v45 }
 0xc6e   : > { %v2570_v3 = vmul.f32 %v3292_v62, %v2562_v0 }
 0xc6f   : > { %v2569_v4 = vmul.f32 %v3292_v62, %v2561_v1 }
 0xc70   : > { %v2578_v6 = vadd.f32 %v3293_v2, %v2570_v3  ;;  %v2899_v3 = vld [vmem:[%s4626_s0] sm:$0xff] (!%p3300_p5) }
 0xc71   : > { %v2577_v5 = vadd.f32 %v3293_v2, %v2569_v4  ;;  %v2900_v4 = vld [vmem:[%s4626_s0 + $0x8] sm:$0xff] (!%p3300_p5) }
 0xc73   : > { %3619 = vmatprep.mubr.msk.f32.mxu0 %vm1415_vm3, %v2577_v5  ;;  %v2901_v5 = vld [vmem:[%s4626_s0 + $0x10] sm:$0xff] (!%p3300_p5) }
 0xc74   : > { %3620 = vmatmul.mubr.msk.f32.vlgmr.msra.gmra.mrb[32].mxu0 %vm1415_vm3, %v2578_v6  ;;  %v3847_v6 = vpack.c.bf16 (!%p3300_p5), %v2900_v4, %v2899_v3  ;;  %v3850_v8 = vpack.c.bf16 (!%p3300_p5), %v2902_v7, %v2901_v5 }
 0xc75   : > { %3661 = vmatprep.mubr.msk.f32.mxu0 (!%p3300_p5), %vm4025_vm7, %v4026_v59 }
 0xd47   : > { %v3621_v31 = vpop.f32.mrb[32].mxu0 }
 0xd48   : > { %v2668_v34 = vadd.f32 %v3621_v31, %v3294_v37  ;;  %v2662_v38 = vpop.f32.mrb[33].mxu0 }
 0xd49   : > { %v2663_v40 = vadd.f32 %v3294_v37, %v2662_v38 }
 0xd4a   : > { %v3298_v42 = vmul.f32 -1.702, %v2668_v34 }
 0xd4b   : > { %v3297_v43 = vmul.f32 -1.702, %v2663_v40 }
 0xd4c   : > { %v2677_v14 = vmul.f32 1.442695, %v3298_v42 }
 0xd4d   : > { %v2675_v41 = vmul.f32 1.442695, %v3297_v43 }
 0xd4e   : > { %3945 = vpow2.f32 %v2677_v14 }
 0xd4f   : > { %3947 = vpow2.f32 %v2675_v41 }
 0xd58   : > { %v3946_v13 = vpop.eup %3945 }
 0xd59   : > { %v3948_v44 = vpop.eup %3947  ;;  %v2680_v45 = vadd.f32 1.0, %v3946_v13 }
 0xd5a   : > { %v2679_v17 = vadd.f32 1.0, %v3948_v44 }
 0xd5b   : > { %3949 = vrcp.f32 %v2680_v45 }
 0xd5c   : > { %3951 = vrcp.f32 %v2679_v17 }
 0xd65   : > { %v3950_v46 = vpop.eup %3949 }
 0xd66   : > { %v3952_v47 = vpop.eup %3951  ;;  %v2686_v49 = vmul.f32 %v3950_v46, %v2668_v34 }
 0xd67   : > { %v2685_v48 = vmul.f32 %v3952_v47, %v2663_v40 }
 0xd69   : > { %3654 = vmatprep.mubr.f32.mxu1 %v2685_v48 }
 0xd6a   : > { %3655 = vmatmul.mubr.f32.vlgmr.msra.gmra.mrb[20].mxu1 %v2686_v49 }
 0xd6b   : > { %3672 = vmatprep.mubr.msk.f32.mxu1 (!%p3300_p5), %vm4025_vm7, %v4026_v59  ;;  %3848 = vmatpush3.bf16.msra.mxu1 (!%p3300_p5), %v3847_v6 }
 0xd6c   : > { %3849 = vmatprep.subr.bf16.mxu1 (!%p3300_p5), %v4024_v58 }
 0xd6f   : > { %3851 = vmatpush3.bf16.msra.mxu1 (!%p3300_p5), %v3850_v8 }
 0xe3d   : > { %v3656_v50 = vpop.f32.mrb[20].mxu1  ;;  %2794 = sbr.rel (%p3300_p5) target bundleno = 4394 (0x112a), region = 148 }
 0xe3e   : > { %v2779_v52 = vadd.f32 %v3656_v50, %v4491_v30  ;;  %v2769_v53 = vpop.f32.mrb[21].mxu1  ;;  %v2795_v30 = vld [vmem:[%s4625_s22] sm:$0x3] (!%p3300_p5) }
 0xe3f   : > { %v2778_v54 = vadd.f32 %v2769_v53, %v4493_v39 }
 0xe40   : > { %v2788_v55 = vadd.f32 %v3299_v51, %v2779_v52 }
 0xe41   : > { %v2787_v56 = vadd.f32 %v3299_v51, %v2778_v54 }
 0xe42   : > { %2790 = vst.msk [vmem:[#allocation2 + $0x8] sm:$0xff] %vm1415_vm3, %v2788_v55 }
 0xe43   : > { %2789 = vst.msk [vmem:[#allocation2] sm:$0xff] %vm1415_vm3, %v2787_v56  ;;  %v3844_v57 = vpack.c.bf16 (!%p3300_p5), %v2788_v55, %v2787_v56 }
 0xe45   : > { %3845 = vmatpush3.bf16.msra.mxu0 %v3844_v57 }
 0xe48   : > { %3662 = vmatmul.mubr.msk.f32.vlgmr.msra.gmra.mrb[0].mxu0 %vm1459_vm4, %v2795_v30 }
 0xf1b   : > { %v2865_v39 = vpop.f32.mrb[0].mxu0 }
 0xf1c   : > { %v3663_v60 = vpop.f32.mrb[1].mxu0  ;;  %v2872_v61 = vsel %vm2871_vm8, %v2865_v39, 0.0 }
 0xf1d   : > { %2873 = vadd.xlane.f32.xlu0 %v2872_v61 }
 0xfaa   : > { %v2874_v62 = vpop.xlane.xlu0 %2873 }
 0xfab   : > { %v2875_v63 = vmul.f32 0.03125, %v2874_v62 }
 0xfad   : > { %v2876_v0 = vsub.f32 %v2865_v39, %v2875_v63 }
 0xfaf   : > { %v2877_v1 = vmul.f32 %v2876_v0, %v2876_v0 }
 0xfb1   : > { %v2878_v2 = vsel %vm2871_vm8, %v2877_v1, 0.0 }
 0xfb2   : > { %2879 = vadd.xlane.f32.xlu0 %v2878_v2 }
0x103f   : > { %v2880_v9 = vpop.xlane.xlu0 %2879 }
0x1040   : > { %v2881_v10 = vmul.f32 0.03125, %v2880_v9 }
0x1042   : > { %v2882_v11 = vadd.f32 1e-05, %v2881_v10 }
0x1044   : > { %3953 = vrsqrt.f32 %v2882_v11 }
0x104e   : > { %v3954_v12 = vpop.eup %3953 }
0x104f   : > { %v2884_v16 = vmul.f32 %v3954_v12, %v2876_v0 }
0x1051   : > { %v2891_v21 = vmul.f32 %v3302_v15, %v2884_v16 }
0x1053   : > { %v2898_v22 = vadd.f32 %v3303_v20, %v2891_v21 }
0x1055   : > { %3673 = vmatmul.mubr.msk.f32.vlgmr.msra.gmra.mrb[0].mxu1 %vm1415_vm3, %v2898_v22 }
0x1128   : > { %v2972_v23 = vpop.f32.mrb[0].mxu1 }
0x1129   : > { %2977 = vst.msk [vmem:[#allocation3] sm:$0x3] %vm2976_vm9, %v2972_v23  ;;  %v3674_v24 = vpop.f32.mrb[1].mxu1 }
0x112a PF: > { %p3856_p6 = scmp.eq.s32.totalorder %s4194_s16, 1  ;;  %s4027_s2 = smov [#allocation3]  }
0x112b   : > { %s2985_s10 = sshll.u32 %s4027_s2, 4  ;;  %s2986_s10 = int_to_ptr.vmem [resolvable:$true] %s2985_s10 }
0x112c   : > { %s3955_s18 = scalar_lea.vmem %s2986_s10, 32  ;;  %p3962_p10 = scmp.lt.s32.totalorder %s2986_s10, %s2986_s10 }
0x112d   : > { %p3956_p7 = scmp.ne.s32.totalorder %s2986_s10, %s3955_s18  ;;  %p3963_p11 = scmp.lt.s32.totalorder %s3955_s18, %s3955_s18 }
0x112f   : > { %p3957_p8 = pnand %p3956_p7, %p3856_p6  ;;  %p3964_p12 = por %p3963_p11, %p3962_p10 }
0x1131   : > { %p3958_p9 = pneg %p3957_p8 }
0x1133   : > { %p3965_p13 = pnand %p3964_p12, %p3958_p9 }
0x1135   : > { %3968 = shalt.err (!%p3965_p13)
}
0x1136   : > { %s4629_s11 = sld [smem:[#allocation23_spill]] }
0x113c   : > { %s3969_s12 = scalar_lea.hbm %s4629_s11, 32 }
0x113d   : > { %p3970_p0 = scmp.ne.s32.totalorder %s4629_s11, %s3969_s12  ;;  %p3975_p3 = scmp.lt.u32.totalorder %s3969_s12, %s4629_s11 }
0x113f   : > { %p3971_p1 = pnand %p3970_p0, %p3856_p6 }
0x1141   : > { %p3972_p2 = pneg %p3971_p1 }
0x1143   : > { %p3977_p4 = pnand %p3975_p3, %p3972_p2 }
0x1145   : > { %3980 = shalt.err (!%p3977_p4)
}
0x1146   : > { %3853 = dma.vmem_to_hbm [thread:$0]  (%p3856_p6), %s2986_s10, 32, %s4629_s11, [#allocation4]  }
0x1147   : > { %3986 = dma.done.wait (%p3856_p6), [#allocation4], 32  }
0x1148   : > { %3988 = vsyncadd (%p3856_p6), [#allocation4], 4294967264 }
0x1149 PF: > { %s4630_s22 = sld [smem:[#allocation24_spill]] }
0x114f   : > { %s72_s15 = sadd.s32 1, %s4630_s22  }
0x1150   : > { %p69_p5 = scmp.ge.s32.totalorder %s72_s15, 4  }
0x1152   :  { %71 = sbr.rel (!%p69_p5) target bundleno = 56 (0x38), region = 250 }
0x1159   :  { %2998 = vsyncpa [#allocation4], 1 }
0x115a   :  { %3000 = vsyncpa [#allocation4 + $0x1], 1 }

</bundles_post_ra>
